<compile_context>
chip_gen: v6e
topology: v6e:2x2x1
jax: 0.10.0
libtpu: 0.0.40
codegen_flags: <defaults>
</compile_context>

<pallas_src>
import functools

import jax
import jax.numpy as jnp
from jax import lax
from jax.experimental import pallas as pl
from jax.experimental.pallas import tpu as pltpu


# --------------------------------------------------------------------------
# Helpers
# --------------------------------------------------------------------------
def _layer_norm(x, w, b, eps=1e-5):
    mu = jnp.mean(x, axis=-1, keepdims=True)
    var = jnp.mean(jnp.square(x - mu), axis=-1, keepdims=True)
    return (x - mu) * lax.rsqrt(var + eps) * w + b


def _recip(x):
    # EUP approximate reciprocal + one Newton step (near-exact, off the VPU).
    r = pl.reciprocal(x, approx=True)
    return r * (2.0 - x * r)


# --------------------------------------------------------------------------
# Fused encoder-stack kernel: grid axis = layer index
# --------------------------------------------------------------------------
def encoder_stack_kernel(src_ref, pos_ref,
                         wqk_ref, bqk_ref, wv_ref, bv_ref,
                         wo_ref, bo_ref, ln1w_ref, ln1b_ref,
                         w1_ref, b1_ref, w2_ref, b2_ref,
                         ln2w_ref, ln2b_ref, fnw_ref, fnb_ref,
                         out_ref,
                         x_scr,
                         *, nhead, batch, seq, apply_final_norm):
    layer = pl.program_id(0)
    last = pl.num_programs(0) - 1
    bf = jnp.bfloat16

    @pl.when(layer == 0)
    def _():
        x_scr[...] = src_ref[...]

    x = x_scr[...]                                  # (B*S, D)  f32, VMEM-resident
    pos = pos_ref[...]                              # (B*S, D)  f32
    D = x.shape[-1]
    hd = D // nhead
    scale = 1.0 / float(hd) ** 0.5

    # --- fused Q|K projection (pos added), separate V projection (no pos) ---
    qk_in = (x + pos).astype(bf)
    qk = jnp.dot(qk_in, wqk_ref[0],
                 preferred_element_type=jnp.float32) + bqk_ref[0]   # (B*S, 2D)
    v = jnp.dot(x.astype(bf), wv_ref[0],
                preferred_element_type=jnp.float32) + bv_ref[0]     # (B*S, D)
    q = qk[:, :D] * scale
    k = qk[:, D:]

    # --- multi-head attention; assemble context, then one Wo matmul ---
    ctx_rows = []
    for b in range(batch):
        rows = slice(b * seq, (b + 1) * seq)
        heads = []
        for h in range(nhead):
            cols = slice(h * hd, (h + 1) * hd)
            qh = q[rows, cols].astype(bf)                           # (S, hd)
            kh = k[rows, cols].astype(bf)
            vh = v[rows, cols].astype(bf)
            s = lax.dot_general(qh, kh, (((1,), (1,)), ((), ())),
                                preferred_element_type=jnp.float32)  # (S, S)
            s = s - jnp.max(s, axis=-1, keepdims=True)
            p = jnp.exp(s)
            p = p * _recip(jnp.sum(p, axis=-1, keepdims=True))
            heads.append(jnp.dot(p.astype(bf), vh,
                                 preferred_element_type=jnp.float32))  # (S, hd)
        ctx_rows.append(jnp.concatenate(heads, axis=-1))            # (S, D)
    ctx = jnp.concatenate(ctx_rows, axis=0)                         # (B*S, D)

    attn = jnp.dot(ctx.astype(bf), wo_ref[0],
                   preferred_element_type=jnp.float32) + bo_ref[0]

    # --- residual + norm1 ---
    x1 = _layer_norm(x + attn, ln1w_ref[0], ln1b_ref[0])

    # --- FFN: linear1 -> relu -> linear2, residual + norm2 ---
    h1 = jnp.dot(x1.astype(bf), w1_ref[0],
                 preferred_element_type=jnp.float32) + b1_ref[0]
    h1 = jnp.maximum(h1, 0.0)
    ff = jnp.dot(h1.astype(bf), w2_ref[0],
                 preferred_element_type=jnp.float32) + b2_ref[0]
    y = _layer_norm(x1 + ff, ln2w_ref[0], ln2b_ref[0])

    x_scr[...] = y

    @pl.when(layer == last)
    def _():
        if apply_final_norm:
            out_ref[...] = _layer_norm(y, fnw_ref[...], fnb_ref[...])
        else:
            out_ref[...] = y


# --------------------------------------------------------------------------
# Wrapper: stack per-layer weights, one pallas_call for the whole encoder
# --------------------------------------------------------------------------
def transformer_encoder(src_sbd, pos_sbd, layer_params, final_norm, nhead):
    """src_sbd / pos_sbd: (S, B, D) as in PyTorch.  Returns (S, B, D)."""
    S, B, D = src_sbd.shape
    L = len(layer_params)
    bf = jnp.bfloat16

    x = jnp.transpose(src_sbd, (1, 0, 2)).reshape(B * S, D).astype(jnp.float32)
    p = jnp.transpose(pos_sbd, (1, 0, 2)).reshape(B * S, D).astype(jnp.float32)

    def stack(name, cast=False):
        a = jnp.stack([lp[name] for lp in layer_params], axis=0)
        return a.astype(bf) if cast else a.astype(jnp.float32)

    # Fused Q|K weight/bias; matmul weights stored bf16, biases/LN params f32.
    wqk = jnp.stack([jnp.concatenate([lp["wq"], lp["wk"]], axis=-1)
                     for lp in layer_params], axis=0).astype(bf)      # (L, D, 2D)
    bqk = jnp.stack([jnp.concatenate([lp["bq"], lp["bk"]], axis=-1)
                     for lp in layer_params], axis=0).astype(jnp.float32)  # (L, 1, 2D)
    weights = [
        wqk, bqk,
        stack("wv", True), stack("bv"),
        stack("wo", True), stack("bo"),
        stack("ln1w"), stack("ln1b"),
        stack("w1", True), stack("b1"),
        stack("w2", True), stack("b2"),
        stack("ln2w"), stack("ln2b"),
    ]

    if final_norm is not None:
        fnw = final_norm["w"].astype(jnp.float32)
        fnb = final_norm["b"].astype(jnp.float32)
        apply_final_norm = True
    else:
        fnw = jnp.ones((1, D), jnp.float32)
        fnb = jnp.zeros((1, D), jnp.float32)
        apply_final_norm = False

    act_spec = pl.BlockSpec((B * S, D), lambda l: (0, 0))

    def wspec(a):
        nd = a.ndim
        return pl.BlockSpec((1,) + a.shape[1:],
                            lambda l, _nd=nd: (l,) + (0,) * (_nd - 1))

    fn_spec = pl.BlockSpec(fnw.shape, lambda l: (0, 0))

    kernel = functools.partial(encoder_stack_kernel, nhead=nhead,
                               batch=B, seq=S,
                               apply_final_norm=apply_final_norm)

    out = pl.pallas_call(
        kernel,
        out_shape=jax.ShapeDtypeStruct((B * S, D), jnp.float32),
        grid=(L,),
        in_specs=[act_spec, act_spec] + [wspec(w) for w in weights]
                 + [fn_spec, fn_spec],
        out_specs=act_spec,
        scratch_shapes=[pltpu.VMEM((B * S, D), jnp.float32)],
        compiler_params=pltpu.CompilerParams(
            dimension_semantics=("arbitrary",)),
    )(x, p, *weights, fnw, fnb)

    return jnp.transpose(out.reshape(B, S, D), (1, 0, 2))


# --------------------------------------------------------------------------
# Pure-JAX reference (same math, same bf16-at-matmul-boundary casting)
# --------------------------------------------------------------------------
def ref_encoder_layer(x, pos, p, nhead):
    bf = jnp.bfloat16
    B, S, D = x.shape
    hd = D // nhead
    qk_in = (x + pos).astype(bf)
    q = jnp.einsum("bsd,dk->bsk", qk_in, p["wq"].astype(bf),
                   preferred_element_type=jnp.float32) + p["bq"][0]
    k = jnp.einsum("bsd,dk->bsk", qk_in, p["wk"].astype(bf),
                   preferred_element_type=jnp.float32) + p["bk"][0]
    v = jnp.einsum("bsd,dk->bsk", x.astype(bf), p["wv"].astype(bf),
                   preferred_element_type=jnp.float32) + p["bv"][0]
    q = (q * (1.0 / float(hd) ** 0.5)).reshape(B, S, nhead, hd).transpose(0, 2, 1, 3)
    k = k.reshape(B, S, nhead, hd).transpose(0, 2, 1, 3)
    v = v.reshape(B, S, nhead, hd).transpose(0, 2, 1, 3)
    s = jnp.einsum("bhqd,bhkd->bhqk", q.astype(bf), k.astype(bf),
                   preferred_element_type=jnp.float32)
    a = jax.nn.softmax(s, axis=-1)
    o = jnp.einsum("bhqk,bhkd->bhqd", a.astype(bf), v.astype(bf),
                   preferred_element_type=jnp.float32)
    o = o.transpose(0, 2, 1, 3).reshape(B, S, D)
    attn = jnp.einsum("bsd,de->bse", o.astype(bf), p["wo"].astype(bf),
                      preferred_element_type=jnp.float32) + p["bo"][0]
    x1 = _layer_norm(x + attn, p["ln1w"][0], p["ln1b"][0])
    h1 = jnp.maximum(jnp.einsum("bsd,df->bsf", x1.astype(bf), p["w1"].astype(bf),
                                preferred_element_type=jnp.float32) + p["b1"][0], 0.0)
    ff = jnp.einsum("bsf,fd->bsd", h1.astype(bf), p["w2"].astype(bf),
                    preferred_element_type=jnp.float32) + p["b2"][0]
    return _layer_norm(x1 + ff, p["ln2w"][0], p["ln2b"][0])


def ref_encoder(src_sbd, pos_sbd, layer_params, final_norm, nhead):
    x = jnp.transpose(src_sbd, (1, 0, 2))
    pos = jnp.transpose(pos_sbd, (1, 0, 2))
    for params in layer_params:
        x = ref_encoder_layer(x, pos, params, nhead)
    if final_norm is not None:
        x = _layer_norm(x, final_norm["w"][0], final_norm["b"][0])
    return jnp.transpose(x, (1, 0, 2))


# --------------------------------------------------------------------------
# Deterministic parameter construction
# --------------------------------------------------------------------------
def make_layer_params(key, d_model, dim_ff):
    ks = jax.random.split(key, 6)
    n = lambda k, s: (0.05 * jax.random.normal(k, s)).astype(jnp.float32)
    return {
        "wq": n(ks[0], (d_model, d_model)), "bq": jnp.zeros((1, d_model), jnp.float32),
        "wk": n(ks[1], (d_model, d_model)), "bk": jnp.zeros((1, d_model), jnp.float32),
        "wv": n(ks[2], (d_model, d_model)), "bv": jnp.zeros((1, d_model), jnp.float32),
        "wo": n(ks[3], (d_model, d_model)), "bo": jnp.zeros((1, d_model), jnp.float32),
        "ln1w": jnp.ones((1, d_model), jnp.float32), "ln1b": jnp.zeros((1, d_model), jnp.float32),
        "w1": n(ks[4], (d_model, dim_ff)), "b1": jnp.zeros((1, dim_ff), jnp.float32),
        "w2": n(ks[5], (dim_ff, d_model)), "b2": jnp.zeros((1, d_model), jnp.float32),
        "ln2w": jnp.ones((1, d_model), jnp.float32), "ln2b": jnp.zeros((1, d_model), jnp.float32),
    }


if __name__ == "__main__":
    # Small but lane-dense config (D multiple of 128 keeps output stores dense).
    S, B, D = 16, 2, 128          # sequence, batch, embedding_dim
    NHEAD, DFF, NUM_LAYERS = 4, 256, 2

    root = jax.random.PRNGKey(0)
    k_src, k_pos, k_layers = jax.random.split(root, 3)
    src = jax.random.normal(k_src, (S, B, D), jnp.float32)
    pos = jax.random.normal(k_pos, (S, B, D), jnp.float32)

    layer_keys = jax.random.split(k_layers, NUM_LAYERS)
    layer_params = [make_layer_params(k, D, DFF) for k in layer_keys]
    final_norm = {"w": jnp.ones((1, D), jnp.float32),
                  "b": jnp.zeros((1, D), jnp.float32)}

    out = transformer_encoder(src, pos, layer_params, final_norm, NHEAD)
    out = jax.block_until_ready(out)

    ref = ref_encoder(src, pos, layer_params, final_norm, NHEAD)
    assert out.shape == (S, B, D)
    assert jnp.allclose(out, ref, atol=1e-2, rtol=1e-2), "mismatch vs reference"

    print("KERNEL_OK")
</pallas_src>

<mosaic_0001>
module attributes {stable_mosaic.version = 11 : i64} {
  func.func @encoder_stack_kernel(%arg0: i32, %arg1: memref<32x128xf32, #tpu.memory_space<vmem>>, %arg2: memref<32x128xf32, #tpu.memory_space<vmem>>, %arg3: memref<1x128x256xbf16, #tpu.memory_space<vmem>>, %arg4: memref<1x1x256xf32, #tpu.memory_space<vmem>>, %arg5: memref<1x128x128xbf16, #tpu.memory_space<vmem>>, %arg6: memref<1x1x128xf32, #tpu.memory_space<vmem>>, %arg7: memref<1x128x128xbf16, #tpu.memory_space<vmem>>, %arg8: memref<1x1x128xf32, #tpu.memory_space<vmem>>, %arg9: memref<1x1x128xf32, #tpu.memory_space<vmem>>, %arg10: memref<1x1x128xf32, #tpu.memory_space<vmem>>, %arg11: memref<1x128x256xbf16, #tpu.memory_space<vmem>>, %arg12: memref<1x1x256xf32, #tpu.memory_space<vmem>>, %arg13: memref<1x256x128xbf16, #tpu.memory_space<vmem>>, %arg14: memref<1x1x128xf32, #tpu.memory_space<vmem>>, %arg15: memref<1x1x128xf32, #tpu.memory_space<vmem>>, %arg16: memref<1x1x128xf32, #tpu.memory_space<vmem>>, %arg17: memref<1x128xf32, #tpu.memory_space<vmem>>, %arg18: memref<1x128xf32, #tpu.memory_space<vmem>>, %arg19: memref<32x128xf32, #tpu.memory_space<vmem>>, %arg20: memref<32x128xf32, #tpu.memory_space<vmem>>) attributes {dimension_semantics = [#tpu.dimension_semantics<arbitrary>], iteration_bounds = array<i64: 2>, scalar_prefetch = 0 : i64, scratch_operands = 1 : i64, tpu.core_type = #tpu.core_type<tc>, window_params = [{pipeline_mode = #tpu.pipeline_mode<synchronous>, transform_indices = @transform_0, window_bounds = array<i64: 32, 128>}, {pipeline_mode = #tpu.pipeline_mode<synchronous>, transform_indices = @transform_1, window_bounds = array<i64: 32, 128>}, {transform_indices = @transform_2, window_bounds = array<i64: 1, 128, 256>}, {transform_indices = @transform_3, window_bounds = array<i64: 1, 1, 256>}, {transform_indices = @transform_4, window_bounds = array<i64: 1, 128, 128>}, {transform_indices = @transform_5, window_bounds = array<i64: 1, 1, 128>}, {transform_indices = @transform_6, window_bounds = array<i64: 1, 128, 128>}, {transform_indices = @transform_7, window_bounds = array<i64: 1, 1, 128>}, {transform_indices = @transform_8, window_bounds = array<i64: 1, 1, 128>}, {transform_indices = @transform_9, window_bounds = array<i64: 1, 1, 128>}, {transform_indices = @transform_10, window_bounds = array<i64: 1, 128, 256>}, {transform_indices = @transform_11, window_bounds = array<i64: 1, 1, 256>}, {transform_indices = @transform_12, window_bounds = array<i64: 1, 256, 128>}, {transform_indices = @transform_13, window_bounds = array<i64: 1, 1, 128>}, {transform_indices = @transform_14, window_bounds = array<i64: 1, 1, 128>}, {transform_indices = @transform_15, window_bounds = array<i64: 1, 1, 128>}, {pipeline_mode = #tpu.pipeline_mode<synchronous>, transform_indices = @transform_16, window_bounds = array<i64: 1, 128>}, {pipeline_mode = #tpu.pipeline_mode<synchronous>, transform_indices = @transform_17, window_bounds = array<i64: 1, 128>}, {pipeline_mode = #tpu.pipeline_mode<synchronous>, transform_indices = @transform_18, window_bounds = array<i64: 32, 128>}]} {
    %c0_i32 = arith.constant 0 : i32
    %0 = arith.cmpi eq, %arg0, %c0_i32 : i32
    %1 = arith.extui %0 : i1 to i32
    %c0_i32_0 = arith.constant 0 : i32
    %2 = arith.cmpi ne, %1, %c0_i32_0 : i32
    scf.if %2 {
      %c0_105 = arith.constant 0 : index
      %c0_106 = arith.constant 0 : index
      %297 = vector.load %arg1[%c0_105, %c0_106] : memref<32x128xf32, #tpu.memory_space<vmem>>, vector<32x128xf32>
      %c0_107 = arith.constant 0 : index
      %c0_108 = arith.constant 0 : index
      %298 = vector.load %arg20[%c0_107, %c0_108] : memref<32x128xf32, #tpu.memory_space<vmem>>, vector<32x128xf32>
      tpu.vector_store %arg20[%c0_107, %c0_108], %297 {strides = array<i32>} : memref<32x128xf32, #tpu.memory_space<vmem>>, vector<32x128xf32>,
    } else {
    }
    %c0 = arith.constant 0 : index
    %c0_1 = arith.constant 0 : index
    %3 = vector.load %arg20[%c0, %c0_1] : memref<32x128xf32, #tpu.memory_space<vmem>>, vector<32x128xf32>
    %c0_2 = arith.constant 0 : index
    %c0_3 = arith.constant 0 : index
    %4 = vector.load %arg2[%c0_2, %c0_3] : memref<32x128xf32, #tpu.memory_space<vmem>>, vector<32x128xf32>
    %5 = arith.addf %3, %4 : vector<32x128xf32>
    %6 = arith.truncf %5 : vector<32x128xf32> to vector<32x128xbf16>
    %c0_4 = arith.constant 0 : index
    %c0_5 = arith.constant 0 : index
    %c0_6 = arith.constant 0 : index
    %7 = vector.load %arg3[%c0_4, %c0_5, %c0_6] : memref<1x128x256xbf16, #tpu.memory_space<vmem>>, vector<1x128x256xbf16>
    %8 = vector.shape_cast %7 : vector<1x128x256xbf16> to vector<128x256xbf16>
    %cst = arith.constant dense<0.000000e+00> : vector<32x256xf32>
    %9 = tpu.matmul %6, %8, %cst {dimension_numbers = #tpu.dot_dimension_numbers<[1], [0], [0], [1], [0, 0, 1, 1], [], []>} : vector<32x128xbf16>, vector<128x256xbf16>, vector<32x256xf32> -> vector<32x256xf32>
    %c0_7 = arith.constant 0 : index
    %c0_8 = arith.constant 0 : index
    %c0_9 = arith.constant 0 : index
    %10 = vector.load %arg4[%c0_7, %c0_8, %c0_9] : memref<1x1x256xf32, #tpu.memory_space<vmem>>, vector<1x1x256xf32>
    %11 = vector.shape_cast %10 : vector<1x1x256xf32> to vector<1x256xf32>
    %12 = vector.broadcast %11 : vector<1x256xf32> to vector<32x256xf32>
    %13 = arith.addf %9, %12 : vector<32x256xf32>
    %14 = arith.truncf %3 : vector<32x128xf32> to vector<32x128xbf16>
    %c0_10 = arith.constant 0 : index
    %c0_11 = arith.constant 0 : index
    %c0_12 = arith.constant 0 : index
    %15 = vector.load %arg5[%c0_10, %c0_11, %c0_12] : memref<1x128x128xbf16, #tpu.memory_space<vmem>>, vector<1x128x128xbf16>
    %16 = vector.shape_cast %15 : vector<1x128x128xbf16> to vector<128x128xbf16>
    %cst_13 = arith.constant dense<0.000000e+00> : vector<32x128xf32>
    %17 = tpu.matmul %14, %16, %cst_13 {dimension_numbers = #tpu.dot_dimension_numbers<[1], [0], [0], [1], [0, 0, 1, 1], [], []>} : vector<32x128xbf16>, vector<128x128xbf16>, vector<32x128xf32> -> vector<32x128xf32>
    %c0_14 = arith.constant 0 : index
    %c0_15 = arith.constant 0 : index
    %c0_16 = arith.constant 0 : index
    %18 = vector.load %arg6[%c0_14, %c0_15, %c0_16] : memref<1x1x128xf32, #tpu.memory_space<vmem>>, vector<1x1x128xf32>
    %19 = vector.shape_cast %18 : vector<1x1x128xf32> to vector<1x128xf32>
    %20 = vector.broadcast %19 : vector<1x128xf32> to vector<32x128xf32>
    %21 = arith.addf %17, %20 : vector<32x128xf32>
    %22 = vector.extract_strided_slice %13 {offsets = [0, 0], sizes = [32, 128], strides = [1, 1]} : vector<32x256xf32> to vector<32x128xf32>
    %cst_17 = arith.constant 0.176776692 : f32
    %23 = vector.broadcast %cst_17 : f32 to vector<32x128xf32>
    %24 = arith.mulf %22, %23 : vector<32x128xf32>
    %25 = vector.extract_strided_slice %13 {offsets = [0, 128], sizes = [32, 128], strides = [1, 1]} : vector<32x256xf32> to vector<32x128xf32>
    %26 = vector.extract_strided_slice %24 {offsets = [0, 0], sizes = [16, 32], strides = [1, 1]} : vector<32x128xf32> to vector<16x32xf32>
    %27 = arith.truncf %26 : vector<16x32xf32> to vector<16x32xbf16>
    %28 = vector.extract_strided_slice %25 {offsets = [0, 0], sizes = [16, 32], strides = [1, 1]} : vector<32x128xf32> to vector<16x32xf32>
    %29 = arith.truncf %28 : vector<16x32xf32> to vector<16x32xbf16>
    %30 = vector.extract_strided_slice %21 {offsets = [0, 0], sizes = [16, 32], strides = [1, 1]} : vector<32x128xf32> to vector<16x32xf32>
    %31 = arith.truncf %30 : vector<16x32xf32> to vector<16x32xbf16>
    %cst_18 = arith.constant dense<0.000000e+00> : vector<16x16xf32>
    %32 = tpu.matmul %27, %29, %cst_18 {dimension_numbers = #tpu.dot_dimension_numbers<[1], [1], [0], [0], [0, 0, 1, 0], [], []>} : vector<16x32xbf16>, vector<16x32xbf16>, vector<16x16xf32> -> vector<16x16xf32>
    %cst_19 = arith.constant dense<0xFF800000> : vector<16xf32>
    %33 = vector.multi_reduction <maximumf>, %32, %cst_19 [1] : vector<16x16xf32> to vector<16xf32>
    %34 = vector.shape_cast %33 : vector<16xf32> to vector<16x1xf32>
    %35 = vector.broadcast %34 : vector<16x1xf32> to vector<16x16xf32>
    %36 = arith.subf %32, %35 : vector<16x16xf32>
    %37 = math.exp %36 : vector<16x16xf32>
    %cst_20 = arith.constant dense<0.000000e+00> : vector<16xf32>
    %38 = vector.multi_reduction <add>, %37, %cst_20 [1] : vector<16x16xf32> to vector<16xf32>
    %39 = vector.shape_cast %38 : vector<16xf32> to vector<16x1xf32>
    %40 = tpu.reciprocal %39 {approx = true} : vector<16x1xf32> -> vector<16x1xf32>
    %41 = arith.mulf %39, %40 : vector<16x1xf32>
    %cst_21 = arith.constant 2.000000e+00 : f32
    %42 = vector.broadcast %cst_21 : f32 to vector<16x1xf32>
    %43 = arith.subf %42, %41 : vector<16x1xf32>
    %44 = arith.mulf %40, %43 : vector<16x1xf32>
    %45 = vector.broadcast %44 : vector<16x1xf32> to vector<16x16xf32>
    %46 = arith.mulf %37, %45 : vector<16x16xf32>
    %47 = arith.truncf %46 : vector<16x16xf32> to vector<16x16xbf16>
    %cst_22 = arith.constant dense<0.000000e+00> : vector<16x32xf32>
    %48 = tpu.matmul %47, %31, %cst_22 {dimension_numbers = #tpu.dot_dimension_numbers<[1], [0], [0], [1], [0, 0, 1, 1], [], []>} : vector<16x16xbf16>, vector<16x32xbf16>, vector<16x32xf32> -> vector<16x32xf32>
    %49 = vector.extract_strided_slice %24 {offsets = [0, 32], sizes = [16, 32], strides = [1, 1]} : vector<32x128xf32> to vector<16x32xf32>
    %50 = arith.truncf %49 : vector<16x32xf32> to vector<16x32xbf16>
    %51 = vector.extract_strided_slice %25 {offsets = [0, 32], sizes = [16, 32], strides = [1, 1]} : vector<32x128xf32> to vector<16x32xf32>
    %52 = arith.truncf %51 : vector<16x32xf32> to vector<16x32xbf16>
    %53 = vector.extract_strided_slice %21 {offsets = [0, 32], sizes = [16, 32], strides = [1, 1]} : vector<32x128xf32> to vector<16x32xf32>
    %54 = arith.truncf %53 : vector<16x32xf32> to vector<16x32xbf16>
    %cst_23 = arith.constant dense<0.000000e+00> : vector<16x16xf32>
    %55 = tpu.matmul %50, %52, %cst_23 {dimension_numbers = #tpu.dot_dimension_numbers<[1], [1], [0], [0], [0, 0, 1, 0], [], []>} : vector<16x32xbf16>, vector<16x32xbf16>, vector<16x16xf32> -> vector<16x16xf32>
    %cst_24 = arith.constant dense<0xFF800000> : vector<16xf32>
    %56 = vector.multi_reduction <maximumf>, %55, %cst_24 [1] : vector<16x16xf32> to vector<16xf32>
    %57 = vector.shape_cast %56 : vector<16xf32> to vector<16x1xf32>
    %58 = vector.broadcast %57 : vector<16x1xf32> to vector<16x16xf32>
    %59 = arith.subf %55, %58 : vector<16x16xf32>
    %60 = math.exp %59 : vector<16x16xf32>
    %cst_25 = arith.constant dense<0.000000e+00> : vector<16xf32>
    %61 = vector.multi_reduction <add>, %60, %cst_25 [1] : vector<16x16xf32> to vector<16xf32>
    %62 = vector.shape_cast %61 : vector<16xf32> to vector<16x1xf32>
    %63 = tpu.reciprocal %62 {approx = true} : vector<16x1xf32> -> vector<16x1xf32>
    %64 = arith.mulf %62, %63 : vector<16x1xf32>
    %cst_26 = arith.constant 2.000000e+00 : f32
    %65 = vector.broadcast %cst_26 : f32 to vector<16x1xf32>
    %66 = arith.subf %65, %64 : vector<16x1xf32>
    %67 = arith.mulf %63, %66 : vector<16x1xf32>
    %68 = vector.broadcast %67 : vector<16x1xf32> to vector<16x16xf32>
    %69 = arith.mulf %60, %68 : vector<16x16xf32>
    %70 = arith.truncf %69 : vector<16x16xf32> to vector<16x16xbf16>
    %cst_27 = arith.constant dense<0.000000e+00> : vector<16x32xf32>
    %71 = tpu.matmul %70, %54, %cst_27 {dimension_numbers = #tpu.dot_dimension_numbers<[1], [0], [0], [1], [0, 0, 1, 1], [], []>} : vector<16x16xbf16>, vector<16x32xbf16>, vector<16x32xf32> -> vector<16x32xf32>
    %72 = vector.extract_strided_slice %24 {offsets = [0, 64], sizes = [16, 32], strides = [1, 1]} : vector<32x128xf32> to vector<16x32xf32>
    %73 = arith.truncf %72 : vector<16x32xf32> to vector<16x32xbf16>
    %74 = vector.extract_strided_slice %25 {offsets = [0, 64], sizes = [16, 32], strides = [1, 1]} : vector<32x128xf32> to vector<16x32xf32>
    %75 = arith.truncf %74 : vector<16x32xf32> to vector<16x32xbf16>
    %76 = vector.extract_strided_slice %21 {offsets = [0, 64], sizes = [16, 32], strides = [1, 1]} : vector<32x128xf32> to vector<16x32xf32>
    %77 = arith.truncf %76 : vector<16x32xf32> to vector<16x32xbf16>
    %cst_28 = arith.constant dense<0.000000e+00> : vector<16x16xf32>
    %78 = tpu.matmul %73, %75, %cst_28 {dimension_numbers = #tpu.dot_dimension_numbers<[1], [1], [0], [0], [0, 0, 1, 0], [], []>} : vector<16x32xbf16>, vector<16x32xbf16>, vector<16x16xf32> -> vector<16x16xf32>
    %cst_29 = arith.constant dense<0xFF800000> : vector<16xf32>
    %79 = vector.multi_reduction <maximumf>, %78, %cst_29 [1] : vector<16x16xf32> to vector<16xf32>
    %80 = vector.shape_cast %79 : vector<16xf32> to vector<16x1xf32>
    %81 = vector.broadcast %80 : vector<16x1xf32> to vector<16x16xf32>
    %82 = arith.subf %78, %81 : vector<16x16xf32>
    %83 = math.exp %82 : vector<16x16xf32>
    %cst_30 = arith.constant dense<0.000000e+00> : vector<16xf32>
    %84 = vector.multi_reduction <add>, %83, %cst_30 [1] : vector<16x16xf32> to vector<16xf32>
    %85 = vector.shape_cast %84 : vector<16xf32> to vector<16x1xf32>
    %86 = tpu.reciprocal %85 {approx = true} : vector<16x1xf32> -> vector<16x1xf32>
    %87 = arith.mulf %85, %86 : vector<16x1xf32>
    %cst_31 = arith.constant 2.000000e+00 : f32
    %88 = vector.broadcast %cst_31 : f32 to vector<16x1xf32>
    %89 = arith.subf %88, %87 : vector<16x1xf32>
    %90 = arith.mulf %86, %89 : vector<16x1xf32>
    %91 = vector.broadcast %90 : vector<16x1xf32> to vector<16x16xf32>
    %92 = arith.mulf %83, %91 : vector<16x16xf32>
    %93 = arith.truncf %92 : vector<16x16xf32> to vector<16x16xbf16>
    %cst_32 = arith.constant dense<0.000000e+00> : vector<16x32xf32>
    %94 = tpu.matmul %93, %77, %cst_32 {dimension_numbers = #tpu.dot_dimension_numbers<[1], [0], [0], [1], [0, 0, 1, 1], [], []>} : vector<16x16xbf16>, vector<16x32xbf16>, vector<16x32xf32> -> vector<16x32xf32>
    %95 = vector.extract_strided_slice %24 {offsets = [0, 96], sizes = [16, 32], strides = [1, 1]} : vector<32x128xf32> to vector<16x32xf32>
    %96 = arith.truncf %95 : vector<16x32xf32> to vector<16x32xbf16>
    %97 = vector.extract_strided_slice %25 {offsets = [0, 96], sizes = [16, 32], strides = [1, 1]} : vector<32x128xf32> to vector<16x32xf32>
    %98 = arith.truncf %97 : vector<16x32xf32> to vector<16x32xbf16>
    %99 = vector.extract_strided_slice %21 {offsets = [0, 96], sizes = [16, 32], strides = [1, 1]} : vector<32x128xf32> to vector<16x32xf32>
    %100 = arith.truncf %99 : vector<16x32xf32> to vector<16x32xbf16>
    %cst_33 = arith.constant dense<0.000000e+00> : vector<16x16xf32>
    %101 = tpu.matmul %96, %98, %cst_33 {dimension_numbers = #tpu.dot_dimension_numbers<[1], [1], [0], [0], [0, 0, 1, 0], [], []>} : vector<16x32xbf16>, vector<16x32xbf16>, vector<16x16xf32> -> vector<16x16xf32>
    %cst_34 = arith.constant dense<0xFF800000> : vector<16xf32>
    %102 = vector.multi_reduction <maximumf>, %101, %cst_34 [1] : vector<16x16xf32> to vector<16xf32>
    %103 = vector.shape_cast %102 : vector<16xf32> to vector<16x1xf32>
    %104 = vector.broadcast %103 : vector<16x1xf32> to vector<16x16xf32>
    %105 = arith.subf %101, %104 : vector<16x16xf32>
    %106 = math.exp %105 : vector<16x16xf32>
    %cst_35 = arith.constant dense<0.000000e+00> : vector<16xf32>
    %107 = vector.multi_reduction <add>, %106, %cst_35 [1] : vector<16x16xf32> to vector<16xf32>
    %108 = vector.shape_cast %107 : vector<16xf32> to vector<16x1xf32>
    %109 = tpu.reciprocal %108 {approx = true} : vector<16x1xf32> -> vector<16x1xf32>
    %110 = arith.mulf %108, %109 : vector<16x1xf32>
    %cst_36 = arith.constant 2.000000e+00 : f32
    %111 = vector.broadcast %cst_36 : f32 to vector<16x1xf32>
    %112 = arith.subf %111, %110 : vector<16x1xf32>
    %113 = arith.mulf %109, %112 : vector<16x1xf32>
    %114 = vector.broadcast %113 : vector<16x1xf32> to vector<16x16xf32>
    %115 = arith.mulf %106, %114 : vector<16x16xf32>
    %116 = arith.truncf %115 : vector<16x16xf32> to vector<16x16xbf16>
    %cst_37 = arith.constant dense<0.000000e+00> : vector<16x32xf32>
    %117 = tpu.matmul %116, %100, %cst_37 {dimension_numbers = #tpu.dot_dimension_numbers<[1], [0], [0], [1], [0, 0, 1, 1], [], []>} : vector<16x16xbf16>, vector<16x32xbf16>, vector<16x32xf32> -> vector<16x32xf32>
    %118 = tpu.concatenate %48, %71, %94, %117 in 1 : vector<16x32xf32>, vector<16x32xf32>, vector<16x32xf32>, vector<16x32xf32> -> vector<16x128xf32>
    %119 = vector.extract_strided_slice %24 {offsets = [16, 0], sizes = [16, 32], strides = [1, 1]} : vector<32x128xf32> to vector<16x32xf32>
    %120 = arith.truncf %119 : vector<16x32xf32> to vector<16x32xbf16>
    %121 = vector.extract_strided_slice %25 {offsets = [16, 0], sizes = [16, 32], strides = [1, 1]} : vector<32x128xf32> to vector<16x32xf32>
    %122 = arith.truncf %121 : vector<16x32xf32> to vector<16x32xbf16>
    %123 = vector.extract_strided_slice %21 {offsets = [16, 0], sizes = [16, 32], strides = [1, 1]} : vector<32x128xf32> to vector<16x32xf32>
    %124 = arith.truncf %123 : vector<16x32xf32> to vector<16x32xbf16>
    %cst_38 = arith.constant dense<0.000000e+00> : vector<16x16xf32>
    %125 = tpu.matmul %120, %122, %cst_38 {dimension_numbers = #tpu.dot_dimension_numbers<[1], [1], [0], [0], [0, 0, 1, 0], [], []>} : vector<16x32xbf16>, vector<16x32xbf16>, vector<16x16xf32> -> vector<16x16xf32>
    %cst_39 = arith.constant dense<0xFF800000> : vector<16xf32>
    %126 = vector.multi_reduction <maximumf>, %125, %cst_39 [1] : vector<16x16xf32> to vector<16xf32>
    %127 = vector.shape_cast %126 : vector<16xf32> to vector<16x1xf32>
    %128 = vector.broadcast %127 : vector<16x1xf32> to vector<16x16xf32>
    %129 = arith.subf %125, %128 : vector<16x16xf32>
    %130 = math.exp %129 : vector<16x16xf32>
    %cst_40 = arith.constant dense<0.000000e+00> : vector<16xf32>
    %131 = vector.multi_reduction <add>, %130, %cst_40 [1] : vector<16x16xf32> to vector<16xf32>
    %132 = vector.shape_cast %131 : vector<16xf32> to vector<16x1xf32>
    %133 = tpu.reciprocal %132 {approx = true} : vector<16x1xf32> -> vector<16x1xf32>
    %134 = arith.mulf %132, %133 : vector<16x1xf32>
    %cst_41 = arith.constant 2.000000e+00 : f32
    %135 = vector.broadcast %cst_41 : f32 to vector<16x1xf32>
    %136 = arith.subf %135, %134 : vector<16x1xf32>
    %137 = arith.mulf %133, %136 : vector<16x1xf32>
    %138 = vector.broadcast %137 : vector<16x1xf32> to vector<16x16xf32>
    %139 = arith.mulf %130, %138 : vector<16x16xf32>
    %140 = arith.truncf %139 : vector<16x16xf32> to vector<16x16xbf16>
    %cst_42 = arith.constant dense<0.000000e+00> : vector<16x32xf32>
    %141 = tpu.matmul %140, %124, %cst_42 {dimension_numbers = #tpu.dot_dimension_numbers<[1], [0], [0], [1], [0, 0, 1, 1], [], []>} : vector<16x16xbf16>, vector<16x32xbf16>, vector<16x32xf32> -> vector<16x32xf32>
    %142 = vector.extract_strided_slice %24 {offsets = [16, 32], sizes = [16, 32], strides = [1, 1]} : vector<32x128xf32> to vector<16x32xf32>
    %143 = arith.truncf %142 : vector<16x32xf32> to vector<16x32xbf16>
    %144 = vector.extract_strided_slice %25 {offsets = [16, 32], sizes = [16, 32], strides = [1, 1]} : vector<32x128xf32> to vector<16x32xf32>
    %145 = arith.truncf %144 : vector<16x32xf32> to vector<16x32xbf16>
    %146 = vector.extract_strided_slice %21 {offsets = [16, 32], sizes = [16, 32], strides = [1, 1]} : vector<32x128xf32> to vector<16x32xf32>
    %147 = arith.truncf %146 : vector<16x32xf32> to vector<16x32xbf16>
    %cst_43 = arith.constant dense<0.000000e+00> : vector<16x16xf32>
    %148 = tpu.matmul %143, %145, %cst_43 {dimension_numbers = #tpu.dot_dimension_numbers<[1], [1], [0], [0], [0, 0, 1, 0], [], []>} : vector<16x32xbf16>, vector<16x32xbf16>, vector<16x16xf32> -> vector<16x16xf32>
    %cst_44 = arith.constant dense<0xFF800000> : vector<16xf32>
    %149 = vector.multi_reduction <maximumf>, %148, %cst_44 [1] : vector<16x16xf32> to vector<16xf32>
    %150 = vector.shape_cast %149 : vector<16xf32> to vector<16x1xf32>
    %151 = vector.broadcast %150 : vector<16x1xf32> to vector<16x16xf32>
    %152 = arith.subf %148, %151 : vector<16x16xf32>
    %153 = math.exp %152 : vector<16x16xf32>
    %cst_45 = arith.constant dense<0.000000e+00> : vector<16xf32>
    %154 = vector.multi_reduction <add>, %153, %cst_45 [1] : vector<16x16xf32> to vector<16xf32>
    %155 = vector.shape_cast %154 : vector<16xf32> to vector<16x1xf32>
    %156 = tpu.reciprocal %155 {approx = true} : vector<16x1xf32> -> vector<16x1xf32>
    %157 = arith.mulf %155, %156 : vector<16x1xf32>
    %cst_46 = arith.constant 2.000000e+00 : f32
    %158 = vector.broadcast %cst_46 : f32 to vector<16x1xf32>
    %159 = arith.subf %158, %157 : vector<16x1xf32>
    %160 = arith.mulf %156, %159 : vector<16x1xf32>
    %161 = vector.broadcast %160 : vector<16x1xf32> to vector<16x16xf32>
    %162 = arith.mulf %153, %161 : vector<16x16xf32>
    %163 = arith.truncf %162 : vector<16x16xf32> to vector<16x16xbf16>
    %cst_47 = arith.constant dense<0.000000e+00> : vector<16x32xf32>
    %164 = tpu.matmul %163, %147, %cst_47 {dimension_numbers = #tpu.dot_dimension_numbers<[1], [0], [0], [1], [0, 0, 1, 1], [], []>} : vector<16x16xbf16>, vector<16x32xbf16>, vector<16x32xf32> -> vector<16x32xf32>
    %165 = vector.extract_strided_slice %24 {offsets = [16, 64], sizes = [16, 32], strides = [1, 1]} : vector<32x128xf32> to vector<16x32xf32>
    %166 = arith.truncf %165 : vector<16x32xf32> to vector<16x32xbf16>
    %167 = vector.extract_strided_slice %25 {offsets = [16, 64], sizes = [16, 32], strides = [1, 1]} : vector<32x128xf32> to vector<16x32xf32>
    %168 = arith.truncf %167 : vector<16x32xf32> to vector<16x32xbf16>
    %169 = vector.extract_strided_slice %21 {offsets = [16, 64], sizes = [16, 32], strides = [1, 1]} : vector<32x128xf32> to vector<16x32xf32>
    %170 = arith.truncf %169 : vector<16x32xf32> to vector<16x32xbf16>
    %cst_48 = arith.constant dense<0.000000e+00> : vector<16x16xf32>
    %171 = tpu.matmul %166, %168, %cst_48 {dimension_numbers = #tpu.dot_dimension_numbers<[1], [1], [0], [0], [0, 0, 1, 0], [], []>} : vector<16x32xbf16>, vector<16x32xbf16>, vector<16x16xf32> -> vector<16x16xf32>
    %cst_49 = arith.constant dense<0xFF800000> : vector<16xf32>
    %172 = vector.multi_reduction <maximumf>, %171, %cst_49 [1] : vector<16x16xf32> to vector<16xf32>
    %173 = vector.shape_cast %172 : vector<16xf32> to vector<16x1xf32>
    %174 = vector.broadcast %173 : vector<16x1xf32> to vector<16x16xf32>
    %175 = arith.subf %171, %174 : vector<16x16xf32>
    %176 = math.exp %175 : vector<16x16xf32>
    %cst_50 = arith.constant dense<0.000000e+00> : vector<16xf32>
    %177 = vector.multi_reduction <add>, %176, %cst_50 [1] : vector<16x16xf32> to vector<16xf32>
    %178 = vector.shape_cast %177 : vector<16xf32> to vector<16x1xf32>
    %179 = tpu.reciprocal %178 {approx = true} : vector<16x1xf32> -> vector<16x1xf32>
    %180 = arith.mulf %178, %179 : vector<16x1xf32>
    %cst_51 = arith.constant 2.000000e+00 : f32
    %181 = vector.broadcast %cst_51 : f32 to vector<16x1xf32>
    %182 = arith.subf %181, %180 : vector<16x1xf32>
    %183 = arith.mulf %179, %182 : vector<16x1xf32>
    %184 = vector.broadcast %183 : vector<16x1xf32> to vector<16x16xf32>
    %185 = arith.mulf %176, %184 : vector<16x16xf32>
    %186 = arith.truncf %185 : vector<16x16xf32> to vector<16x16xbf16>
    %cst_52 = arith.constant dense<0.000000e+00> : vector<16x32xf32>
    %187 = tpu.matmul %186, %170, %cst_52 {dimension_numbers = #tpu.dot_dimension_numbers<[1], [0], [0], [1], [0, 0, 1, 1], [], []>} : vector<16x16xbf16>, vector<16x32xbf16>, vector<16x32xf32> -> vector<16x32xf32>
    %188 = vector.extract_strided_slice %24 {offsets = [16, 96], sizes = [16, 32], strides = [1, 1]} : vector<32x128xf32> to vector<16x32xf32>
    %189 = arith.truncf %188 : vector<16x32xf32> to vector<16x32xbf16>
    %190 = vector.extract_strided_slice %25 {offsets = [16, 96], sizes = [16, 32], strides = [1, 1]} : vector<32x128xf32> to vector<16x32xf32>
    %191 = arith.truncf %190 : vector<16x32xf32> to vector<16x32xbf16>
    %192 = vector.extract_strided_slice %21 {offsets = [16, 96], sizes = [16, 32], strides = [1, 1]} : vector<32x128xf32> to vector<16x32xf32>
    %193 = arith.truncf %192 : vector<16x32xf32> to vector<16x32xbf16>
    %cst_53 = arith.constant dense<0.000000e+00> : vector<16x16xf32>
    %194 = tpu.matmul %189, %191, %cst_53 {dimension_numbers = #tpu.dot_dimension_numbers<[1], [1], [0], [0], [0, 0, 1, 0], [], []>} : vector<16x32xbf16>, vector<16x32xbf16>, vector<16x16xf32> -> vector<16x16xf32>
    %cst_54 = arith.constant dense<0xFF800000> : vector<16xf32>
    %195 = vector.multi_reduction <maximumf>, %194, %cst_54 [1] : vector<16x16xf32> to vector<16xf32>
    %196 = vector.shape_cast %195 : vector<16xf32> to vector<16x1xf32>
    %197 = vector.broadcast %196 : vector<16x1xf32> to vector<16x16xf32>
    %198 = arith.subf %194, %197 : vector<16x16xf32>
    %199 = math.exp %198 : vector<16x16xf32>
    %cst_55 = arith.constant dense<0.000000e+00> : vector<16xf32>
    %200 = vector.multi_reduction <add>, %199, %cst_55 [1] : vector<16x16xf32> to vector<16xf32>
    %201 = vector.shape_cast %200 : vector<16xf32> to vector<16x1xf32>
    %202 = tpu.reciprocal %201 {approx = true} : vector<16x1xf32> -> vector<16x1xf32>
    %203 = arith.mulf %201, %202 : vector<16x1xf32>
    %cst_56 = arith.constant 2.000000e+00 : f32
    %204 = vector.broadcast %cst_56 : f32 to vector<16x1xf32>
    %205 = arith.subf %204, %203 : vector<16x1xf32>
    %206 = arith.mulf %202, %205 : vector<16x1xf32>
    %207 = vector.broadcast %206 : vector<16x1xf32> to vector<16x16xf32>
    %208 = arith.mulf %199, %207 : vector<16x16xf32>
    %209 = arith.truncf %208 : vector<16x16xf32> to vector<16x16xbf16>
    %cst_57 = arith.constant dense<0.000000e+00> : vector<16x32xf32>
    %210 = tpu.matmul %209, %193, %cst_57 {dimension_numbers = #tpu.dot_dimension_numbers<[1], [0], [0], [1], [0, 0, 1, 1], [], []>} : vector<16x16xbf16>, vector<16x32xbf16>, vector<16x32xf32> -> vector<16x32xf32>
    %211 = tpu.concatenate %141, %164, %187, %210 in 1 : vector<16x32xf32>, vector<16x32xf32>, vector<16x32xf32>, vector<16x32xf32> -> vector<16x128xf32>
    %212 = tpu.concatenate %118, %211 in 0 : vector<16x128xf32>, vector<16x128xf32> -> vector<32x128xf32>
    %213 = arith.truncf %212 : vector<32x128xf32> to vector<32x128xbf16>
    %c0_58 = arith.constant 0 : index
    %c0_59 = arith.constant 0 : index
    %c0_60 = arith.constant 0 : index
    %214 = vector.load %arg7[%c0_58, %c0_59, %c0_60] : memref<1x128x128xbf16, #tpu.memory_space<vmem>>, vector<1x128x128xbf16>
    %215 = vector.shape_cast %214 : vector<1x128x128xbf16> to vector<128x128xbf16>
    %cst_61 = arith.constant dense<0.000000e+00> : vector<32x128xf32>
    %216 = tpu.matmul %213, %215, %cst_61 {dimension_numbers = #tpu.dot_dimension_numbers<[1], [0], [0], [1], [0, 0, 1, 1], [], []>} : vector<32x128xbf16>, vector<128x128xbf16>, vector<32x128xf32> -> vector<32x128xf32>
    %c0_62 = arith.constant 0 : index
    %c0_63 = arith.constant 0 : index
    %c0_64 = arith.constant 0 : index
    %217 = vector.load %arg8[%c0_62, %c0_63, %c0_64] : memref<1x1x128xf32, #tpu.memory_space<vmem>>, vector<1x1x128xf32>
    %218 = vector.shape_cast %217 : vector<1x1x128xf32> to vector<1x128xf32>
    %219 = vector.broadcast %218 : vector<1x128xf32> to vector<32x128xf32>
    %220 = arith.addf %216, %219 : vector<32x128xf32>
    %221 = arith.addf %3, %220 : vector<32x128xf32>
    %c0_65 = arith.constant 0 : index
    %c0_66 = arith.constant 0 : index
    %c0_67 = arith.constant 0 : index
    %222 = vector.load %arg9[%c0_65, %c0_66, %c0_67] : memref<1x1x128xf32, #tpu.memory_space<vmem>>, vector<1x1x128xf32>
    %223 = vector.shape_cast %222 : vector<1x1x128xf32> to vector<1x128xf32>
    %c0_68 = arith.constant 0 : index
    %c0_69 = arith.constant 0 : index
    %c0_70 = arith.constant 0 : index
    %224 = vector.load %arg10[%c0_68, %c0_69, %c0_70] : memref<1x1x128xf32, #tpu.memory_space<vmem>>, vector<1x1x128xf32>
    %225 = vector.shape_cast %224 : vector<1x1x128xf32> to vector<1x128xf32>
    %cst_71 = arith.constant dense<0.000000e+00> : vector<32xf32>
    %226 = vector.multi_reduction <add>, %221, %cst_71 [1] : vector<32x128xf32> to vector<32xf32>
    %227 = vector.shape_cast %226 : vector<32xf32> to vector<32x1xf32>
    %cst_72 = arith.constant 1.280000e+02 : f32
    %228 = vector.broadcast %cst_72 : f32 to vector<32x1xf32>
    %229 = arith.divf %227, %228 : vector<32x1xf32>
    %230 = vector.broadcast %229 : vector<32x1xf32> to vector<32x128xf32>
    %231 = arith.subf %221, %230 : vector<32x128xf32>
    %232 = arith.mulf %231, %231 : vector<32x128xf32>
    %cst_73 = arith.constant dense<0.000000e+00> : vector<32xf32>
    %233 = vector.multi_reduction <add>, %232, %cst_73 [1] : vector<32x128xf32> to vector<32xf32>
    %234 = vector.shape_cast %233 : vector<32xf32> to vector<32x1xf32>
    %cst_74 = arith.constant 1.280000e+02 : f32
    %235 = vector.broadcast %cst_74 : f32 to vector<32x1xf32>
    %236 = arith.divf %234, %235 : vector<32x1xf32>
    %237 = vector.broadcast %229 : vector<32x1xf32> to vector<32x128xf32>
    %238 = arith.subf %221, %237 : vector<32x128xf32>
    %cst_75 = arith.constant 9.99999974E-6 : f32
    %239 = vector.broadcast %cst_75 : f32 to vector<32x1xf32>
    %240 = arith.addf %236, %239 : vector<32x1xf32>
    %241 = math.rsqrt %240 : vector<32x1xf32>
    %242 = vector.broadcast %241 : vector<32x1xf32> to vector<32x128xf32>
    %243 = arith.mulf %238, %242 : vector<32x128xf32>
    %244 = vector.broadcast %223 : vector<1x128xf32> to vector<32x128xf32>
    %245 = arith.mulf %243, %244 : vector<32x128xf32>
    %246 = vector.broadcast %225 : vector<1x128xf32> to vector<32x128xf32>
    %247 = arith.addf %245, %246 : vector<32x128xf32>
    %248 = arith.truncf %247 : vector<32x128xf32> to vector<32x128xbf16>
    %c0_76 = arith.constant 0 : index
    %c0_77 = arith.constant 0 : index
    %c0_78 = arith.constant 0 : index
    %249 = vector.load %arg11[%c0_76, %c0_77, %c0_78] : memref<1x128x256xbf16, #tpu.memory_space<vmem>>, vector<1x128x256xbf16>
    %250 = vector.shape_cast %249 : vector<1x128x256xbf16> to vector<128x256xbf16>
    %cst_79 = arith.constant dense<0.000000e+00> : vector<32x256xf32>
    %251 = tpu.matmul %248, %250, %cst_79 {dimension_numbers = #tpu.dot_dimension_numbers<[1], [0], [0], [1], [0, 0, 1, 1], [], []>} : vector<32x128xbf16>, vector<128x256xbf16>, vector<32x256xf32> -> vector<32x256xf32>
    %c0_80 = arith.constant 0 : index
    %c0_81 = arith.constant 0 : index
    %c0_82 = arith.constant 0 : index
    %252 = vector.load %arg12[%c0_80, %c0_81, %c0_82] : memref<1x1x256xf32, #tpu.memory_space<vmem>>, vector<1x1x256xf32>
    %253 = vector.shape_cast %252 : vector<1x1x256xf32> to vector<1x256xf32>
    %254 = vector.broadcast %253 : vector<1x256xf32> to vector<32x256xf32>
    %255 = arith.addf %251, %254 : vector<32x256xf32>
    %cst_83 = arith.constant 0.000000e+00 : f32
    %256 = vector.broadcast %cst_83 : f32 to vector<32x256xf32>
    %257 = arith.maximumf %255, %256 : vector<32x256xf32>
    %258 = arith.truncf %257 : vector<32x256xf32> to vector<32x256xbf16>
    %c0_84 = arith.constant 0 : index
    %c0_85 = arith.constant 0 : index
    %c0_86 = arith.constant 0 : index
    %259 = vector.load %arg13[%c0_84, %c0_85, %c0_86] : memref<1x256x128xbf16, #tpu.memory_space<vmem>>, vector<1x256x128xbf16>
    %260 = vector.shape_cast %259 : vector<1x256x128xbf16> to vector<256x128xbf16>
    %cst_87 = arith.constant dense<0.000000e+00> : vector<32x128xf32>
    %261 = tpu.matmul %258, %260, %cst_87 {dimension_numbers = #tpu.dot_dimension_numbers<[1], [0], [0], [1], [0, 0, 1, 1], [], []>} : vector<32x256xbf16>, vector<256x128xbf16>, vector<32x128xf32> -> vector<32x128xf32>
    %c0_88 = arith.constant 0 : index
    %c0_89 = arith.constant 0 : index
    %c0_90 = arith.constant 0 : index
    %262 = vector.load %arg14[%c0_88, %c0_89, %c0_90] : memref<1x1x128xf32, #tpu.memory_space<vmem>>, vector<1x1x128xf32>
    %263 = vector.shape_cast %262 : vector<1x1x128xf32> to vector<1x128xf32>
    %264 = vector.broadcast %263 : vector<1x128xf32> to vector<32x128xf32>
    %265 = arith.addf %261, %264 : vector<32x128xf32>
    %266 = arith.addf %247, %265 : vector<32x128xf32>
    %c0_91 = arith.constant 0 : index
    %c0_92 = arith.constant 0 : index
    %c0_93 = arith.constant 0 : index
    %267 = vector.load %arg15[%c0_91, %c0_92, %c0_93] : memref<1x1x128xf32, #tpu.memory_space<vmem>>, vector<1x1x128xf32>
    %268 = vector.shape_cast %267 : vector<1x1x128xf32> to vector<1x128xf32>
    %c0_94 = arith.constant 0 : index
    %c0_95 = arith.constant 0 : index
    %c0_96 = arith.constant 0 : index
    %269 = vector.load %arg16[%c0_94, %c0_95, %c0_96] : memref<1x1x128xf32, #tpu.memory_space<vmem>>, vector<1x1x128xf32>
    %270 = vector.shape_cast %269 : vector<1x1x128xf32> to vector<1x128xf32>
    %cst_97 = arith.constant dense<0.000000e+00> : vector<32xf32>
    %271 = vector.multi_reduction <add>, %266, %cst_97 [1] : vector<32x128xf32> to vector<32xf32>
    %272 = vector.shape_cast %271 : vector<32xf32> to vector<32x1xf32>
    %cst_98 = arith.constant 1.280000e+02 : f32
    %273 = vector.broadcast %cst_98 : f32 to vector<32x1xf32>
    %274 = arith.divf %272, %273 : vector<32x1xf32>
    %275 = vector.broadcast %274 : vector<32x1xf32> to vector<32x128xf32>
    %276 = arith.subf %266, %275 : vector<32x128xf32>
    %277 = arith.mulf %276, %276 : vector<32x128xf32>
    %cst_99 = arith.constant dense<0.000000e+00> : vector<32xf32>
    %278 = vector.multi_reduction <add>, %277, %cst_99 [1] : vector<32x128xf32> to vector<32xf32>
    %279 = vector.shape_cast %278 : vector<32xf32> to vector<32x1xf32>
    %cst_100 = arith.constant 1.280000e+02 : f32
    %280 = vector.broadcast %cst_100 : f32 to vector<32x1xf32>
    %281 = arith.divf %279, %280 : vector<32x1xf32>
    %282 = vector.broadcast %274 : vector<32x1xf32> to vector<32x128xf32>
    %283 = arith.subf %266, %282 : vector<32x128xf32>
    %cst_101 = arith.constant 9.99999974E-6 : f32
    %284 = vector.broadcast %cst_101 : f32 to vector<32x1xf32>
    %285 = arith.addf %281, %284 : vector<32x1xf32>
    %286 = math.rsqrt %285 : vector<32x1xf32>
    %287 = vector.broadcast %286 : vector<32x1xf32> to vector<32x128xf32>
    %288 = arith.mulf %283, %287 : vector<32x128xf32>
    %289 = vector.broadcast %268 : vector<1x128xf32> to vector<32x128xf32>
    %290 = arith.mulf %288, %289 : vector<32x128xf32>
    %291 = vector.broadcast %270 : vector<1x128xf32> to vector<32x128xf32>
    %292 = arith.addf %290, %291 : vector<32x128xf32>
    %c0_102 = arith.constant 0 : index
    %c0_103 = arith.constant 0 : index
    %293 = vector.load %arg20[%c0_102, %c0_103] : memref<32x128xf32, #tpu.memory_space<vmem>>, vector<32x128xf32>
    tpu.vector_store %arg20[%c0_102, %c0_103], %292 {strides = array<i32>} : memref<32x128xf32, #tpu.memory_space<vmem>>, vector<32x128xf32>,
    %c1_i32 = arith.constant 1 : i32
    %294 = arith.cmpi eq, %arg0, %c1_i32 : i32
    %295 = arith.extui %294 : i1 to i32
    %c0_i32_104 = arith.constant 0 : i32
    %296 = arith.cmpi ne, %295, %c0_i32_104 : i32
    scf.if %296 {
      %c0_105 = arith.constant 0 : index
      %c0_106 = arith.constant 0 : index
      %297 = vector.load %arg17[%c0_105, %c0_106] : memref<1x128xf32, #tpu.memory_space<vmem>>, vector<1x128xf32>
      %c0_107 = arith.constant 0 : index
      %c0_108 = arith.constant 0 : index
      %298 = vector.load %arg18[%c0_107, %c0_108] : memref<1x128xf32, #tpu.memory_space<vmem>>, vector<1x128xf32>
      %cst_109 = arith.constant dense<0.000000e+00> : vector<32xf32>
      %299 = vector.multi_reduction <add>, %292, %cst_109 [1] : vector<32x128xf32> to vector<32xf32>
      %300 = vector.shape_cast %299 : vector<32xf32> to vector<32x1xf32>
      %cst_110 = arith.constant 1.280000e+02 : f32
      %301 = vector.broadcast %cst_110 : f32 to vector<32x1xf32>
      %302 = arith.divf %300, %301 : vector<32x1xf32>
      %303 = vector.broadcast %302 : vector<32x1xf32> to vector<32x128xf32>
      %304 = arith.subf %292, %303 : vector<32x128xf32>
      %305 = arith.mulf %304, %304 : vector<32x128xf32>
      %cst_111 = arith.constant dense<0.000000e+00> : vector<32xf32>
      %306 = vector.multi_reduction <add>, %305, %cst_111 [1] : vector<32x128xf32> to vector<32xf32>
      %307 = vector.shape_cast %306 : vector<32xf32> to vector<32x1xf32>
      %cst_112 = arith.constant 1.280000e+02 : f32
      %308 = vector.broadcast %cst_112 : f32 to vector<32x1xf32>
      %309 = arith.divf %307, %308 : vector<32x1xf32>
      %310 = vector.broadcast %302 : vector<32x1xf32> to vector<32x128xf32>
      %311 = arith.subf %292, %310 : vector<32x128xf32>
      %cst_113 = arith.constant 9.99999974E-6 : f32
      %312 = vector.broadcast %cst_113 : f32 to vector<32x1xf32>
      %313 = arith.addf %309, %312 : vector<32x1xf32>
      %314 = math.rsqrt %313 : vector<32x1xf32>
      %315 = vector.broadcast %314 : vector<32x1xf32> to vector<32x128xf32>
      %316 = arith.mulf %311, %315 : vector<32x128xf32>
      %317 = vector.broadcast %297 : vector<1x128xf32> to vector<32x128xf32>
      %318 = arith.mulf %316, %317 : vector<32x128xf32>
      %319 = vector.broadcast %298 : vector<1x128xf32> to vector<32x128xf32>
      %320 = arith.addf %318, %319 : vector<32x128xf32>
      %c0_114 = arith.constant 0 : index
      %c0_115 = arith.constant 0 : index
      %321 = vector.load %arg19[%c0_114, %c0_115] : memref<32x128xf32, #tpu.memory_space<vmem>>, vector<32x128xf32>
      tpu.vector_store %arg19[%c0_114, %c0_115], %320 {strides = array<i32>} : memref<32x128xf32, #tpu.memory_space<vmem>>, vector<32x128xf32>,
    } else {
    }
    return
  }
  func.func @transform_0(%arg0: i32) -> (i32, i32) {
    %c0_i32 = arith.constant 0 : i32
    %c0_i32_0 = arith.constant 0 : i32
    %c0_i32_1 = arith.constant 0 : i32
    return %c0_i32, %c0_i32_0 : i32, i32
  }
  func.func @transform_1(%arg0: i32) -> (i32, i32) {
    %c0_i32 = arith.constant 0 : i32
    %c0_i32_0 = arith.constant 0 : i32
    %c0_i32_1 = arith.constant 0 : i32
    return %c0_i32, %c0_i32_0 : i32, i32
  }
  func.func @transform_2(%arg0: i32) -> (i32, i32, i32) {
    %c0_i32 = arith.constant 0 : i32
    %c0_i32_0 = arith.constant 0 : i32
    %c0_i32_1 = arith.constant 0 : i32
    return %arg0, %c0_i32, %c0_i32_0 : i32, i32, i32
  }
  func.func @transform_3(%arg0: i32) -> (i32, i32, i32) {
    %c0_i32 = arith.constant 0 : i32
    %c0_i32_0 = arith.constant 0 : i32
    %c0_i32_1 = arith.constant 0 : i32
    return %arg0, %c0_i32, %c0_i32_0 : i32, i32, i32
  }
  func.func @transform_4(%arg0: i32) -> (i32, i32, i32) {
    %c0_i32 = arith.constant 0 : i32
    %c0_i32_0 = arith.constant 0 : i32
    %c0_i32_1 = arith.constant 0 : i32
    return %arg0, %c0_i32, %c0_i32_0 : i32, i32, i32
  }
  func.func @transform_5(%arg0: i32) -> (i32, i32, i32) {
    %c0_i32 = arith.constant 0 : i32
    %c0_i32_0 = arith.constant 0 : i32
    %c0_i32_1 = arith.constant 0 : i32
    return %arg0, %c0_i32, %c0_i32_0 : i32, i32, i32
  }
  func.func @transform_6(%arg0: i32) -> (i32, i32, i32) {
    %c0_i32 = arith.constant 0 : i32
    %c0_i32_0 = arith.constant 0 : i32
    %c0_i32_1 = arith.constant 0 : i32
    return %arg0, %c0_i32, %c0_i32_0 : i32, i32, i32
  }
  func.func @transform_7(%arg0: i32) -> (i32, i32, i32) {
    %c0_i32 = arith.constant 0 : i32
    %c0_i32_0 = arith.constant 0 : i32
    %c0_i32_1 = arith.constant 0 : i32
    return %arg0, %c0_i32, %c0_i32_0 : i32, i32, i32
  }
  func.func @transform_8(%arg0: i32) -> (i32, i32, i32) {
    %c0_i32 = arith.constant 0 : i32
    %c0_i32_0 = arith.constant 0 : i32
    %c0_i32_1 = arith.constant 0 : i32
    return %arg0, %c0_i32, %c0_i32_0 : i32, i32, i32
  }
  func.func @transform_9(%arg0: i32) -> (i32, i32, i32) {
    %c0_i32 = arith.constant 0 : i32
    %c0_i32_0 = arith.constant 0 : i32
    %c0_i32_1 = arith.constant 0 : i32
    return %arg0, %c0_i32, %c0_i32_0 : i32, i32, i32
  }
  func.func @transform_10(%arg0: i32) -> (i32, i32, i32) {
    %c0_i32 = arith.constant 0 : i32
    %c0_i32_0 = arith.constant 0 : i32
    %c0_i32_1 = arith.constant 0 : i32
    return %arg0, %c0_i32, %c0_i32_0 : i32, i32, i32
  }
  func.func @transform_11(%arg0: i32) -> (i32, i32, i32) {
    %c0_i32 = arith.constant 0 : i32
    %c0_i32_0 = arith.constant 0 : i32
    %c0_i32_1 = arith.constant 0 : i32
    return %arg0, %c0_i32, %c0_i32_0 : i32, i32, i32
  }
  func.func @transform_12(%arg0: i32) -> (i32, i32, i32) {
    %c0_i32 = arith.constant 0 : i32
    %c0_i32_0 = arith.constant 0 : i32
    %c0_i32_1 = arith.constant 0 : i32
    return %arg0, %c0_i32, %c0_i32_0 : i32, i32, i32
  }
  func.func @transform_13(%arg0: i32) -> (i32, i32, i32) {
    %c0_i32 = arith.constant 0 : i32
    %c0_i32_0 = arith.constant 0 : i32
    %c0_i32_1 = arith.constant 0 : i32
    return %arg0, %c0_i32, %c0_i32_0 : i32, i32, i32
  }
  func.func @transform_14(%arg0: i32) -> (i32, i32, i32) {
    %c0_i32 = arith.constant 0 : i32
    %c0_i32_0 = arith.constant 0 : i32
    %c0_i32_1 = arith.constant 0 : i32
    return %arg0, %c0_i32, %c0_i32_0 : i32, i32, i32
  }
  func.func @transform_15(%arg0: i32) -> (i32, i32, i32) {
    %c0_i32 = arith.constant 0 : i32
    %c0_i32_0 = arith.constant 0 : i32
    %c0_i32_1 = arith.constant 0 : i32
    return %arg0, %c0_i32, %c0_i32_0 : i32, i32, i32
  }
  func.func @transform_16(%arg0: i32) -> (i32, i32) {
    %c0_i32 = arith.constant 0 : i32
    %c0_i32_0 = arith.constant 0 : i32
    %c0_i32_1 = arith.constant 0 : i32
    return %c0_i32, %c0_i32_0 : i32, i32
  }
  func.func @transform_17(%arg0: i32) -> (i32, i32) {
    %c0_i32 = arith.constant 0 : i32
    %c0_i32_0 = arith.constant 0 : i32
    %c0_i32_1 = arith.constant 0 : i32
    return %c0_i32, %c0_i32_0 : i32, i32
  }
  func.func @transform_18(%arg0: i32) -> (i32, i32) {
    %c0_i32 = arith.constant 0 : i32
    %c0_i32_0 = arith.constant 0 : i32
    %c0_i32_1 = arith.constant 0 : i32
    return %c0_i32, %c0_i32_0 : i32, i32
  }
}

</mosaic_0001>

<bundles_post_ra>
// kernel: tpu_custom_call.1
= control target key start
LH: loop header
LB: loop body
LE: loop exit
PB: predicated region body
PF: predicated region fallthrough
CT: control target
= control target key end

     0   :  { %s5127_s0 = inlined_call_operand.hbm [shape: f32[32,128], index: 0, kind: input, shape index: {}]   ;;  %s5128_s1 = inlined_call_operand.hbm [shape: f32[32,128], index: 1, kind: input, shape index: {}]   ;;  %s5129_s2 = inlined_call_operand.hbm [shape: bf16[2,128,256], index: 2, kind: input, shape index: {}]   ;;  %s5130_s3 = inlined_call_operand.vmem [shape: f32[2,1,256], index: 3, kind: input, shape index: {}]   ;;  %s5131_s4 = inlined_call_operand.hbm [shape: bf16[2,128,128], index: 4, kind: input, shape index: {}]   ;;  %s5132_s5 = inlined_call_operand.hbm [shape: f32[2,1,128], index: 5, kind: input, shape index: {}]   ;;  %s5133_s6 = inlined_call_operand.hbm [shape: bf16[2,128,128], index: 6, kind: input, shape index: {}]   ;;  %s5134_s7 = inlined_call_operand.vmem [shape: f32[2,1,128], index: 7, kind: input, shape index: {}]   ;;  %s5135_s8 = inlined_call_operand.vmem [shape: f32[2,1,128], index: 8, kind: input, shape index: {}]   ;;  %s5136_s9 = inlined_call_operand.vmem [shape: f32[2,1,128], index: 9, kind: input, shape index: {}]   ;;  %s5137_s10 = inlined_call_operand.hbm [shape: bf16[2,128,256], index: 10, kind: input, shape index: {}]   ;;  %s5138_s11 = inlined_call_operand.vmem [shape: f32[2,1,256], index: 11, kind: input, shape index: {}]   ;;  %s5139_s12 = inlined_call_operand.hbm [shape: bf16[2,256,128], index: 12, kind: input, shape index: {}]   ;;  %s5140_s13 = inlined_call_operand.vmem [shape: f32[2,1,128], index: 13, kind: input, shape index: {}]   ;;  %s5141_s14 = inlined_call_operand.vmem [shape: f32[2,1,128], index: 14, kind: input, shape index: {}]   ;;  %s5142_s15 = inlined_call_operand.vmem [shape: f32[2,1,128], index: 15, kind: input, shape index: {}]   ;;  %s5143_s16 = inlined_call_operand.vmem [shape: f32[1,128], index: 16, kind: input, shape index: {}]   ;;  %s5144_s17 = inlined_call_operand.vmem [shape: f32[1,128], index: 17, kind: input, shape index: {}]   ;;  %s5145_s18 = inlined_call_operand.hbm [shape: f32[32,128], index: 18, kind: output, shape index: {}]  }
   0x1   :  { %5165 = sst [smem:[#allocation24_spill]] %s5127_s0 }
   0x2   :  { %5166 = sst [smem:[#allocation25_spill]] %s5128_s1 }
   0x3   :  { %5167 = sst [smem:[#allocation26_spill]] %s5129_s2 }
   0x4   :  { %5168 = sst [smem:[#allocation27_spill]] %s5130_s3 }
   0x5   :  { %5169 = sst [smem:[#allocation28_spill]] %s5131_s4 }
   0x6   :  { %5170 = sst [smem:[#allocation29_spill]] %s5132_s5 }
   0x7   :  { %5171 = sst [smem:[#allocation30_spill]] %s5133_s6 }
   0x8   :  { %5172 = sst [smem:[#allocation31_spill]] %s5134_s7 }
   0x9   :  { %5173 = sst [smem:[#allocation32_spill]] %s5135_s8 }
   0xa   :  { %5174 = sst [smem:[#allocation33_spill]] %s5136_s9 }
   0xb   :  { %5175 = sst [smem:[#allocation34_spill]] %s5138_s11 }
   0xc   :  { %5176 = sst [smem:[#allocation35_spill]] %s5140_s13 }
   0xd   :  { %5177 = sst [smem:[#allocation36_spill]] %s5141_s14 }
   0xe   :  { %5178 = sst [smem:[#allocation37_spill]] %s5142_s15 }
   0xf   :  { %5179 = sst [smem:[#allocation38_spill]] %s5143_s16 }
  0x10   :  { %5180 = sst [smem:[#allocation39_spill]] %s5144_s17 }
  0x11   :  { %5181 = sst [smem:[#allocation40_spill]] %s5145_s18 }
  0x12   :  { %23 = vsyncpa [#allocation4], 0 }
  0x13   :  { %24 = vsyncpa [#allocation7], 0 }
  0x14   :  { %25 = vsyncpa [#allocation5], 0  ;;  %s4312_s27 = smov 0   ;;  %s4314_s28 = smov 0  }
  0x15   :  { %s4316_s29 = smov 0   ;;  %s4318_s30 = smov 0  }
  0x16 LB: > { %5182 = sst [smem:[#allocation19_spill]] %s4186_s28  ;;  %s4331_s0 = sadd.s32 4294967295, %s4194_s30   ;;  %s4194_s30 = sphi %s4318_s30, %s5234_s30   ;;  %s4190_s29 = sphi %s4316_s29, %s5237_s29   ;;  %s4186_s28 = sphi %s4314_s28, %s5236_s28   ;;  %s4182_s27 = sphi %s4312_s27, %s5235_s27  }
  0x17   : > { %5183 = sst [smem:[#allocation20_spill]] %s4190_s29  ;;  %s4334_s19 = sadd.s32 1, %s4194_s30  }
  0x18   : > { %5184 = sst [smem:[#allocation21_spill]] %s4334_s19  ;;  %s77_s1 = ssub.s32 %s4194_s30, %s4334_s19 }
  0x19   : > { %s80_s20 = sadd.s32 1, %s4190_s29  ;;  %p78_p0 = scmp.eq.s32.totalorder %s77_s1, 0 }
  0x1a   : > { %p87_p1 = scmp.ne.s32.totalorder %s4190_s29, %s4186_s28  ;;  %p88_p2 = scmp.eq.s32.totalorder %s4194_s30, 0 }
  0x1b   : > { %p93_p3 = scmp.ne.s32.totalorder %s4186_s28, %s4182_s27  ;;  %p5147_p5 = scmp.eq.s32.totalorder %s4331_s0, 0 }
  0x1c   : > { %s4344_s21 = scalar_select %p78_p0, %s4190_s29, %s80_s20  }
  0x1d   : > { %p4346_p4 = por %p88_p2, %p87_p1  ;;  %p3252_p6 = scmp.ge.s32.totalorder %s4194_s30, 1 }
  0x1e   : > { %5185 = sst [smem:[#allocation22_spill]] %s4344_s21  ;;  %p505_p7 = scmp.lt.s32.totalorder %s4194_s30, 3 }
  0x1f   : > { %p4355_p8 = por %p5147_p5, %p93_p3  ;;  %s4196_s24 = smov [#allocation3]  }
  0x20   : > { %p4360_p10 = pnand %p3252_p6, %p505_p7  ;;  %s517_s25 = sshll.u32 %s4196_s24, 4  ;;  %s518_s25 = int_to_ptr.vmem [resolvable:$true] %s517_s25 }
  0x21   : > { %s5187_s2 = scalar_select %p4355_p8, 1, 0 }
  0x22   : > { %s5189_s23 = scalar_select %p4360_p10, 1, 0 }
  0x23   : > { %5188 = sst [smem:[#allocation23_spill]] %s5187_s2  ;;  %p3622_p11 = pneg %p4360_p10 }
  0x24   : > { %p3650_p13 = scmp.lt.s32.totalorder %s4194_s30, 2  ;;  %s550_s27 = sand.u32 1, %s4194_s30  }
  0x25   : > { %p4368_p12 = pnand %p3622_p11, %p5147_p5  ;;  %s4375_s1 = sand.u32 1, %s4190_s29  }
  0x26   : > { %p4379_p0 = pnand %p3650_p13, %p4346_p4  ;;  %s3915_s24 = scalar_lea.vmem %s518_s25, 512 }
  0x27   : > { %s5190_s26 = scalar_select %p4368_p12, 1, 0 }
  0x28   : > { %p5153_p1 = pneg %p4368_p12  ;;  %p3916_p2 = scmp.ne.s32.totalorder %s518_s25, %s3915_s24 }
  0x29   : > { %p3923_p7 = scmp.lt.s32.totalorder %s518_s25, %s518_s25  ;;  %p3924_p11 = scmp.lt.s32.totalorder %s3915_s24, %s3915_s24 }
  0x2a   : > { %p3918_p3 = pnand %p3916_p2, %p5153_p1 }
  0x2b   : > { %p3925_p9 = por %p3924_p11, %p3923_p7 }
  0x2c   : > { %p3919_p6 = pneg %p3918_p3 }
  0x2e   : > { %p3926_p5 = pnand %p3925_p9, %p3919_p6 }
  0x30   : > { %3929 = shalt.err (!%p3926_p5)
}
  0x31   : > { %s5151_s21 = smov 128   ;;  %s5159_s22 = smov 8  }
  0x32   : > { %s5192_s18 = sld [smem:[#allocation24_spill]]  ;;  %s4397_s17 = sshll.u32 %s4375_s1, 7 }
  0x33   : > { %s4400_s24 = sshll.u32 %s4194_s30, 11  ;;  %s5193_s14 = sld [smem:[#allocation26_spill]] }
  0x34   : > { %s554_s11 = scalar_lea.vmem [#allocation8], %s4397_s17  ;;  %p4418_p5 = pneg %p4379_p0 }
  0x35   : > { %s561_s9 = sshll.u32 %s554_s11, 4  ;;  %s4410_s9 = int_to_ptr.vmem [resolvable:$true] %s561_s9 }
  0x38   : > { %3625 = dma.hbm_to_vmem [thread:$0]  (!%p4368_p12), %s5192_s18, 512, %s518_s25, [#allocation4], %s5151_s21, %s5151_s21, %s5159_s22  }
  0x39   : > { %s4406_s13 = scalar_lea.hbm %s5193_s14, %s4400_s24  ;;  %s4412_s18 = scalar_lea.sflag [#allocation4], %s550_s27 }
  0x3a   : > { %s3930_s29 = scalar_lea.hbm %s4406_s13, 2048  ;;  %s3935_s11 = scalar_lea.hbm %s5193_s14, 4096 }
  0x3b   : > { %p3931_p4 = scmp.ne.s32.totalorder %s4406_s13, %s3930_s29  ;;  %p3936_p2 = scmp.lt.s32.totalorder %s4406_s13, %s5193_s14 }
  0x3c   : > { %p3937_p3 = scmp.lt.s32.totalorder %s3935_s11, %s3930_s29 }
  0x3d   : > { %p3933_p9 = pnand %p4418_p5, %p3931_p4 }
  0x3e   : > { %p3938_p6 = por %p3937_p3, %p3936_p2 }
  0x3f   : > { %p3934_p13 = pneg %p3933_p9 }
  0x41   : > { %p3939_p7 = pnand %p3938_p6, %p3934_p13 }
  0x43   : > { %3942 = shalt.err (!%p3939_p7)
}
  0x44   : > { %s3943_s27 = scalar_lea.vmem %s4410_s9, 2048  ;;  %s4199_s21 = smov [#allocation8]  }
  0x45   : > { %p3944_p11 = scmp.ne.s32.totalorder %s4410_s9, %s3943_s27  ;;  %s3948_s15 = sshll.u32 %s4199_s21, 4  ;;  %s3949_s15 = int_to_ptr.vmem [resolvable:$false] %s3948_s15 }
  0x46   : > { %s3950_s16 = scalar_lea.vmem %s3949_s15, 4096  ;;  %p3951_p1 = scmp.lt.s32.totalorder %s4410_s9, %s3949_s15 }
  0x47   : > { %p3946_p4 = pnand %p3944_p11, %p4418_p5  ;;  %p3952_p8 = scmp.lt.s32.totalorder %s3950_s16, %s3943_s27 }
  0x49   : > { %p3947_p9 = pneg %p3946_p4  ;;  %p3953_p10 = por %p3952_p8, %p3951_p1 }
  0x4b   : > { %p3954_p12 = pnand %p3953_p10, %p3947_p9 }
  0x4d   : > { %3957 = shalt.err (!%p3954_p12)
}
  0x4e   : > { %s5195_s8 = smov 128   ;;  %s5161_s21 = sshll.u32 %s4194_s30, 10 }
  0x4f   : > { %3632 = dma.hbm_to_vmem [thread:$0]  (!%p4379_p0), %s4406_s13, 2048, %s4410_s9, %s4412_s18, %s5195_s8, %s5195_s8, %s5159_s22  }
  0x50   : > { %s5196_s29 = sshll.u32 %s4375_s1, 6  ;;  %s5197_s4 = sld [smem:[#allocation28_spill]] }
  0x51   : > { %s582_s11 = scalar_lea.vmem [#allocation9], %s5196_s29 }
  0x52   : > { %s589_s25 = sshll.u32 %s582_s11, 4  ;;  %s4454_s25 = int_to_ptr.vmem [resolvable:$true] %s589_s25 }
  0x56   : > { %s4452_s16 = scalar_lea.hbm %s5197_s4, %s5161_s21  ;;  %s3963_s29 = scalar_lea.hbm %s5197_s4, 2048 }
  0x57   : > { %s3958_s14 = scalar_lea.hbm %s4452_s16, 1024  ;;  %p3964_p1 = scmp.lt.s32.totalorder %s4452_s16, %s5197_s4 }
  0x58   : > { %p3959_p8 = scmp.ne.s32.totalorder %s4452_s16, %s3958_s14  ;;  %p3965_p13 = scmp.lt.s32.totalorder %s3963_s29, %s3958_s14 }
  0x5a   : > { %p3961_p10 = pnand %p3959_p8, %p4418_p5  ;;  %p3966_p2 = por %p3965_p13, %p3964_p1 }
  0x5c   : > { %p3962_p12 = pneg %p3961_p10 }
  0x5e   : > { %p3967_p3 = pnand %p3966_p2, %p3962_p12 }
  0x60   : > { %3970 = shalt.err (!%p3967_p3)
}
  0x61   : > { %s3971_s27 = scalar_lea.vmem %s4454_s25, 1024  ;;  %s4200_s15 = smov [#allocation9]  }
  0x62   : > { %p3972_p6 = scmp.ne.s32.totalorder %s4454_s25, %s3971_s27  ;;  %s3976_s9 = sshll.u32 %s4200_s15, 4  ;;  %s3977_s9 = int_to_ptr.vmem [resolvable:$false] %s3976_s9 }
  0x63   : > { %s3978_s13 = scalar_lea.vmem %s3977_s9, 2048  ;;  %p3979_p4 = scmp.lt.s32.totalorder %s4454_s25, %s3977_s9 }
  0x64   : > { %p3974_p7 = pnand %p3972_p6, %p4418_p5  ;;  %p3980_p9 = scmp.lt.s32.totalorder %s3978_s13, %s3971_s27 }
  0x66   : > { %p3975_p11 = pneg %p3974_p7  ;;  %p3981_p8 = por %p3980_p9, %p3979_p4 }
  0x68   : > { %p3982_p10 = pnand %p3981_p8, %p3975_p11 }
  0x6a   : > { %3985 = shalt.err (!%p3982_p10)
}
  0x6b   : > { %s4201_s14 = smov 64   ;;  %s4202_s22 = smov 4  }
  0x6c   : > { %3635 = dma.hbm_to_vmem [thread:$0]  (!%p4379_p0), %s4452_s16, 1024, %s4454_s25, %s4412_s18, %s4201_s14, %s4201_s14, %s4202_s22  }
  0x6d   : > { %s3262_s29 = sshll.u32 %s4194_s30, 4  ;;  %s5198_s5 = sld [smem:[#allocation29_spill]] }
  0x6e   : > { %s602_s9 = scalar_lea.vmem [#allocation10], %s4375_s1 }
  0x6f   : > { %s609_s13 = sshll.u32 %s602_s9, 4  ;;  %s610_s13 = int_to_ptr.vmem [resolvable:$true] %s609_s13 }
  0x73   : > { %s607_s15 = scalar_lea.hbm %s5198_s5, %s3262_s29  ;;  %s3991_s7 = scalar_lea.hbm %s5198_s5, 32 }
  0x74   : > { %s3986_s21 = scalar_lea.hbm %s607_s15, 16  ;;  %p3992_p2 = scmp.lt.s32.totalorder %s607_s15, %s5198_s5 }
  0x75   : > { %p3987_p12 = scmp.ne.s32.totalorder %s607_s15, %s3986_s21  ;;  %p3993_p3 = scmp.lt.s32.totalorder %s3991_s7, %s3986_s21 }
  0x77   : > { %p3989_p1 = pnand %p3987_p12, %p4418_p5  ;;  %p3994_p6 = por %p3993_p3, %p3992_p2 }
  0x79   : > { %p3990_p13 = pneg %p3989_p1 }
  0x7b   : > { %p3995_p7 = pnand %p3994_p6, %p3990_p13 }
  0x7d   : > { %3998 = shalt.err (!%p3995_p7)
}
  0x7e   : > { %s3999_s25 = scalar_lea.vmem %s610_s13, 16  ;;  %s4203_s16 = smov [#allocation10]  }
  0x7f   : > { %p4000_p11 = scmp.ne.s32.totalorder %s610_s13, %s3999_s25  ;;  %s4004_s29 = sshll.u32 %s4203_s16, 4  ;;  %s4005_s29 = int_to_ptr.vmem [resolvable:$false] %s4004_s29 }
  0x80   : > { %s4006_s11 = scalar_lea.vmem %s4005_s29, 32  ;;  %p4007_p8 = scmp.lt.s32.totalorder %s610_s13, %s4005_s29 }
  0x81   : > { %p4002_p4 = pnand %p4000_p11, %p4418_p5  ;;  %p4008_p10 = scmp.lt.s32.totalorder %s4006_s11, %s3999_s25 }
  0x83   : > { %p4003_p9 = pneg %p4002_p4  ;;  %p4009_p12 = por %p4008_p10, %p4007_p8 }
  0x85   : > { %p4010_p1 = pnand %p4009_p12, %p4003_p9 }
  0x87   : > { %4013 = shalt.err (!%p4010_p1)
}
  0x88   : > { %3638 = dma.hbm_to_vmem [thread:$0]  (!%p4379_p0), %s607_s15, 16, %s610_s13, %s4412_s18  }
  0x89   : > { %s5199_s3 = sshll.u32 %s4194_s30, 10  ;;  %s5200_s6 = sld [smem:[#allocation30_spill]] }
  0x8a   : > { %s5201_s2 = sshll.u32 %s4375_s1, 6 }
  0x8b   : > { %s620_s21 = scalar_lea.vmem [#allocation11], %s5201_s2 }
  0x8c   : > { %s627_s27 = sshll.u32 %s620_s21, 4  ;;  %s628_s27 = int_to_ptr.vmem [resolvable:$true] %s627_s27 }
  0x8f   : > { %s4503_s28 = scalar_lea.hbm %s5200_s6, %s5199_s3  ;;  %s4019_s30 = scalar_lea.hbm %s5200_s6, 2048 }
  0x90   : > { %s4014_s9 = scalar_lea.hbm %s4503_s28, 1024  ;;  %p4020_p6 = scmp.lt.s32.totalorder %s4503_s28, %s5200_s6 }
  0x91   : > { %p4015_p13 = scmp.ne.s32.totalorder %s4503_s28, %s4014_s9  ;;  %p4021_p7 = scmp.lt.s32.totalorder %s4019_s30, %s4014_s9 }
  0x93   : > { %p4017_p2 = pnand %p4015_p13, %p4418_p5  ;;  %p4022_p11 = por %p4021_p7, %p4020_p6 }
  0x95   : > { %p4018_p3 = pneg %p4017_p2 }
  0x97   : > { %p4023_p4 = pnand %p4022_p11, %p4018_p3 }
  0x99   : > { %4026 = shalt.err (!%p4023_p4)
}
  0x9a   : > { %s4027_s1 = scalar_lea.vmem %s628_s27, 1024  ;;  %s4204_s29 = smov [#allocation11]  }
  0x9b   : > { %p4028_p9 = scmp.ne.s32.totalorder %s628_s27, %s4027_s1  ;;  %s4032_s11 = sshll.u32 %s4204_s29, 4  ;;  %s4033_s11 = int_to_ptr.vmem [resolvable:$false] %s4032_s11 }
  0x9c   : > { %s4034_s3 = scalar_lea.vmem %s4033_s11, 2048  ;;  %p4035_p12 = scmp.lt.s32.totalorder %s628_s27, %s4033_s11 }
  0x9d   : > { %p4030_p8 = pnand %p4028_p9, %p4418_p5  ;;  %p4036_p1 = scmp.lt.s32.totalorder %s4034_s3, %s4027_s1 }
  0x9f   : > { %p4031_p10 = pneg %p4030_p8  ;;  %p4037_p13 = por %p4036_p1, %p4035_p12 }
  0xa1   : > { %p4038_p2 = pnand %p4037_p13, %p4031_p10 }
  0xa3   : > { %4041 = shalt.err (!%p4038_p2)
}
  0xa4   : > { %3641 = dma.hbm_to_vmem [thread:$0]  (!%p4379_p0), %s4503_s28, 1024, %s628_s27, %s4412_s18, %s4201_s14, %s4201_s14, %s4202_s22  }
  0xa5   : > { %s4531_s2 = scalar_lea.hbm %s5137_s10, %s4400_s24  ;;  %s659_s21 = scalar_lea.vmem [#allocation12], %s4397_s17 }
  0xa6   : > { %s666_s9 = sshll.u32 %s659_s21, 4  ;;  %s4042_s25 = scalar_lea.hbm %s4531_s2, 2048  ;;  %s667_s9 = int_to_ptr.vmem [resolvable:$true] %s666_s9 }
  0xa7   : > { %p4043_p3 = scmp.ne.s32.totalorder %s4531_s2, %s4042_s25  ;;  %s4047_s28 = scalar_lea.hbm %s5137_s10, 4096 }
  0xa8   : > { %p4048_p11 = scmp.lt.s32.totalorder %s4531_s2, %s5137_s10  ;;  %p4049_p4 = scmp.lt.s32.totalorder %s4047_s28, %s4042_s25 }
  0xa9   : > { %p4045_p6 = pnand %p4043_p3, %p4418_p5 }
  0xaa   : > { %p4050_p9 = por %p4049_p4, %p4048_p11 }
  0xab   : > { %p4046_p7 = pneg %p4045_p6 }
  0xad   : > { %p4051_p8 = pnand %p4050_p9, %p4046_p7 }
  0xaf   : > { %4054 = shalt.err (!%p4051_p8)
}
  0xb0   : > { %s4055_s16 = scalar_lea.vmem %s667_s9, 2048  ;;  %s4205_s1 = smov [#allocation12]  }
  0xb1   : > { %p4056_p10 = scmp.ne.s32.totalorder %s667_s9, %s4055_s16  ;;  %s4060_s29 = sshll.u32 %s4205_s1, 4  ;;  %s4061_s29 = int_to_ptr.vmem [resolvable:$false] %s4060_s29 }
  0xb2   : > { %s4062_s11 = scalar_lea.vmem %s4061_s29, 4096  ;;  %p4063_p13 = scmp.lt.s32.totalorder %s667_s9, %s4061_s29 }
  0xb3   : > { %p4058_p12 = pnand %p4056_p10, %p4418_p5  ;;  %p4064_p2 = scmp.lt.s32.totalorder %s4062_s11, %s4055_s16 }
  0xb5   : > { %p4059_p1 = pneg %p4058_p12  ;;  %p4065_p3 = por %p4064_p2, %p4063_p13 }
  0xb7   : > { %p4066_p6 = pnand %p4065_p3, %p4059_p1 }
  0xb9   : > { %4069 = shalt.err (!%p4066_p6)
}
  0xba   : > { %s5202_s3 = smov 8   ;;  %s4206_s4 = smov [#allocation6]  }
  0xbb   : > { %3644 = dma.hbm_to_vmem [thread:$0]  (!%p4379_p0), %s4531_s2, 2048, %s667_s9, %s4412_s18, %s5195_s8, %s5195_s8, %s5202_s3  }
  0xbc   : > { %s530_s7 = sshll.u32 %s4206_s4, 4  ;;  %s4558_s15 = scalar_lea.hbm %s5139_s12, %s4400_s24  ;;  %s531_s7 = int_to_ptr.vmem [resolvable:$true] %s530_s7 }
  0xbd   : > { %s4081_s30 = scalar_lea.vmem %s531_s7, 512  ;;  %p5203_p11 = scmp.ne.s32.totalorder %s5190_s26, 0 }
  0xbe   : > { %p4082_p7 = scmp.ne.s32.totalorder %s531_s7, %s4081_s30  ;;  %p4089_p10 = scmp.lt.s32.totalorder %s531_s7, %s531_s7 }
  0xbf   : > { %p5204_p4 = pneg %p5203_p11  ;;  %p4090_p12 = scmp.lt.s32.totalorder %s4081_s30, %s4081_s30 }
  0xc1   : > { %p4084_p9 = pnand %p4082_p7, %p5204_p4  ;;  %p4091_p1 = por %p4090_p12, %p4089_p10 }
  0xc3   : > { %p4085_p8 = pneg %p4084_p9 }
  0xc5   : > { %p4092_p13 = pnand %p4091_p1, %p4085_p8 }
  0xc7   : > { %4095 = shalt.err (!%p4092_p13)
}
  0xc8   : > { %s5205_s24 = sld [smem:[#allocation25_spill]]  ;;  %s687_s28 = scalar_lea.vmem [#allocation13], %s4397_s17 }
  0xc9   : > { %s694_s27 = sshll.u32 %s687_s28, 4  ;;  %s4096_s13 = scalar_lea.hbm %s4558_s15, 2048  ;;  %s695_s27 = int_to_ptr.vmem [resolvable:$true] %s694_s27 }
  0xca   : > { %p4097_p2 = scmp.ne.s32.totalorder %s4558_s15, %s4096_s13  ;;  %s4101_s1 = scalar_lea.hbm %s5139_s12, 4096 }
  0xcb   : > { %p4102_p7 = scmp.lt.s32.totalorder %s4558_s15, %s5139_s12  ;;  %p4103_p4 = scmp.lt.s32.totalorder %s4101_s1, %s4096_s13 }
  0xcc   : > { %p4099_p3 = pnand %p4097_p2, %p4418_p5 }
  0xcd   : > { %p4104_p9 = por %p4103_p4, %p4102_p7 }
  0xce   : > { %3628 = dma.hbm_to_vmem [thread:$0]  (!%p5203_p11), %s5205_s24, 512, %s531_s7, [#allocation7], %s5195_s8, %s5195_s8, %s5202_s3  }
  0xcf   : > { %p4100_p6 = pneg %p4099_p3 }
  0xd1   : > { %p4105_p8 = pnand %p4104_p9, %p4100_p6 }
  0xd3   : > { %4108 = shalt.err (!%p4105_p8)
}
  0xd4   : > { %s4109_s17 = scalar_lea.vmem %s695_s27, 2048  ;;  %s4207_s8 = smov [#allocation13]  }
  0xd5   : > { %p4110_p11 = scmp.ne.s32.totalorder %s695_s27, %s4109_s17  ;;  %s4114_s3 = sshll.u32 %s4207_s8, 4  ;;  %s4115_s3 = int_to_ptr.vmem [resolvable:$false] %s4114_s3 }
  0xd6   : > { %s4116_s4 = scalar_lea.vmem %s4115_s3, 4096  ;;  %p4117_p1 = scmp.lt.s32.totalorder %s695_s27, %s4115_s3 }
  0xd7   : > { %p4112_p10 = pnand %p4110_p11, %p4418_p5  ;;  %p4118_p13 = scmp.lt.s32.totalorder %s4116_s4, %s4109_s17 }
  0xd9   : > { %p4113_p12 = pneg %p4112_p10  ;;  %p4119_p2 = por %p4118_p13, %p4117_p1 }
  0xdb   : > { %p4120_p3 = pnand %p4119_p2, %p4113_p12 }
  0xdd   : > { %4123 = shalt.err (!%p4120_p3)
}
  0xde   : > { %3647 = dma.hbm_to_vmem [thread:$0]  (!%p4379_p0), %s4558_s15, 2048, %s695_s27, %s4412_s18, %s4201_s14, %s4201_s14, %s4202_s22  }
  0xdf   : > { %p5206_p5 = scmp.ne.s32.totalorder %s5189_s23, 0 }
  0xe0   : > { %p5207_p6 = scmp.eq.s32.totalorder (!%p5206_p5), %s4331_s0, 0 }
  0xe1   : > { %724 = sbr.rel (%p5206_p5) target bundleno = 3125 (0xc35), region = 92 }
  0xe6   : > { %4165 = dma.done.wait (%p5207_p6), [#allocation4], 512   ;;  %p5208_p7 = pmov %p5207_p6 }
  0xe7   : > { %p5209_p4 = pmov %p5207_p6 }
  0xe8   : > { %4167 = vsyncadd (%p5208_p7), [#allocation4], 4294966784 }
  0xe9   : > { %4169 = dma.done.wait (%p5209_p4), [#allocation7], 512   ;;  %p5210_p9 = pmov %p5209_p4 }
  0xea   : > { %s5211_s20 = sld [smem:[#allocation19_spill]]  ;;  %s734_s7 = sand.u32 1, %s4331_s0  }
  0xeb   : > { %4171 = vsyncadd (%p5210_p9), [#allocation7], 4294966784  ;;  %s5212_s19 = sld [smem:[#allocation23_spill]]  ;;  %s735_s14 = scalar_lea.sflag [#allocation4], %s734_s7 }
  0xf0   : > { %s4604_s18 = sand.u32 1, %s5211_s20  }
  0xf1   : > { %s3275_s23 = sshll.u32 %s4604_s18, 7  ;;  %p5213_p0 = scmp.ne.s32.totalorder %s5212_s19, 0 }
  0xf2   : > { %s4607_s22 = scalar_lea.vmem [#allocation8], %s3275_s23 }
  0xf3   : > { %4173 = dma.done.wait (%p5213_p0), %s735_s14, 8208  }
  0xf4   : > { %4175 = vsyncadd (%p5213_p0), %s735_s14, 4294959088  ;;  %s3276_s21 = sshll.u32 %s4604_s18, 6  ;;  %p880_p8 = scmp.lt.s32.totalorder %s4331_s0, 1 }
  0xf5   : > { %s5215_s13 = sld [smem:[#allocation27_spill]]  ;;  %s4653_s11 = scalar_lea.vmem [#allocation9], %s3276_s21 }
  0xf6   : > { %s4616_s25 = scalar_select %p880_p8, %s4331_s0, 1 }
  0xf7   : > { %s5217_s3 = sld [smem:[#allocation33_spill]]  ;;  %s755_s17 = scalar_lea.vmem [#allocation10], %s4604_s18 }
  0xf8   : > { %s3280_s15 = sshll.u32 %s4616_s25, 1  ;;  %s5218_s7 = sld [smem:[#allocation34_spill]] }
  0xf9   : > { %s5219_s9 = sld [smem:[#allocation35_spill]]  ;;  %s4656_s8 = scalar_lea.vmem [#allocation11], %s3276_s21 }
  0xfa   : > { %s5221_s1 = sld [smem:[#allocation37_spill]]  ;;  %p5222_p11 = scmp.ne.s32.totalorder %s4331_s0, 0 }
  0xfb   : > { %s4626_s26 = scalar_lea.vmem %s5215_s13, %s3280_s15  ;;  %s5220_s13 = sld [smem:[#allocation36_spill]] }
  0xfd   : > { %s892_s4 = scalar_lea.vmem %s5217_s3, %s4616_s25  ;;  %s4658_s3 = scalar_lea.vmem [#allocation12], %s3275_s23 }
  0xfe   : > { %s4639_s14 = scalar_lea.vmem %s5218_s7, %s3280_s15  ;;  %s4660_s15 = scalar_lea.vmem [#allocation13], %s3275_s23 }
  0xff   : > { %s899_s24 = scalar_lea.vmem %s5219_s9, %s4616_s25  ;;  %910 = sbr.rel (%p5222_p11) target bundleno = 263 (0x107), region = 128 }
 0x100   : > { %s905_s29 = scalar_lea.vmem %s5221_s1, %s4616_s25 }
 0x101   : > { %s902_s5 = scalar_lea.vmem %s5220_s13, %s4616_s25 }
 0x104   : > { %v911_v0 = vld [vmem:[#allocation3] sm:$0xff]  ;;  %v912_v1 = vld [vmem:[#allocation3 + $0x8] sm:$0xff]  ;;  %v913_v2 = vld [vmem:[#allocation3 + $0x10] sm:$0xff] }
 0x105   : > { %915 = vst [vmem:[#allocation2 + $0x10] sm:$0xff] %v911_v0  ;;  %916 = vst [vmem:[#allocation2] sm:$0xff] %v912_v1  ;;  %v914_v3 = vld [vmem:[#allocation3 + $0x18] sm:$0xff] }
 0x106   : > { %917 = vst [vmem:[#allocation2 + $0x18] sm:$0xff] %v913_v2  ;;  %918 = vst [vmem:[#allocation2 + $0x8] sm:$0xff] %v914_v3 }
 0x107 PF: > { %v3732_v4 = vld [vmem:[%s4607_s22 + $0x74] ss:$8 sps:$4 sm:$0xff]   ;;  %v3734_v5 = vld [vmem:[%s4607_s22 + $0x70] ss:$8 sps:$4 sm:$0xff]   ;;  %v4208_v6 = vmov 0   ;;  %v923_v21 = vld [vmem:[#allocation6] sm:$0xff]  ;;  %v951_v46 = vlaneseq }
 0x108   : > { %1073 = vmatprep.mubr.bf16.mxu0 %v4208_v6  ;;  %1041 = vmatprep.subr.bf16.mxu0 %v3732_v4  ;;  %v3735_v7 = vld [vmem:[%s4607_s22 + $0x64] ss:$8 sps:$4 sm:$0xff]   ;;  %v3737_v8 = vld [vmem:[%s4607_s22 + $0x60] ss:$8 sps:$4 sm:$0xff]   ;;  %v3738_v9 = vld [vmem:[%s4607_s22 + $0x54] ss:$8 sps:$4 sm:$0xff]  }
 0x109   : > { %1042 = vmatpush1.bf16.msra.mxu0 %v3734_v5  ;;  %v3740_v10 = vld [vmem:[%s4607_s22 + $0x50] ss:$8 sps:$4 sm:$0xff]   ;;  %v3741_v11 = vld [vmem:[%s4607_s22 + $0x44] ss:$8 sps:$4 sm:$0xff]   ;;  %v3743_v12 = vld [vmem:[%s4607_s22 + $0x40] ss:$8 sps:$4 sm:$0xff]  }
 0x10a   : > { %1043 = vmatprep.subr.bf16.mxu0 %v3735_v7  ;;  %v3744_v13 = vld [vmem:[%s4607_s22 + $0x34] ss:$8 sps:$4 sm:$0xff]   ;;  %v3746_v14 = vld [vmem:[%s4607_s22 + $0x30] ss:$8 sps:$4 sm:$0xff]   ;;  %v3747_v15 = vld [vmem:[%s4607_s22 + $0x24] ss:$8 sps:$4 sm:$0xff]  }
 0x10b   : > { %v3749_v16 = vld [vmem:[%s4607_s22 + $0x20] ss:$8 sps:$4 sm:$0xff]   ;;  %v3750_v17 = vld [vmem:[%s4607_s22 + $0x14] ss:$8 sps:$4 sm:$0xff]   ;;  %v3752_v18 = vld [vmem:[%s4607_s22 + $0x10] ss:$8 sps:$4 sm:$0xff]  }
 0x10c   : > { %v919_v19 = vld [vmem:[#allocation2 + $0x10] sm:$0xff]  ;;  %v920_v20 = vld [vmem:[#allocation2] sm:$0xff]  ;;  %v924_v22 = vld [vmem:[#allocation6 + $0x8] sm:$0xff]  ;;  %v4209_v35 = vmov 0.0   ;;  %vm4210_vm0 = vmmov 0   ;;  %v4696_v47 = vshrl.u32 %v951_v46, 7 }
 0x10d   : > { %1044 = vmatpush1.bf16.msra.mxu0 %v3737_v8  ;;  %v3753_v23 = vld [vmem:[%s4607_s22 + $0x4] ss:$8 sps:$4 sm:$0xff]   ;;  %v3755_v24 = vld [vmem:[%s4607_s22] ss:$8 sps:$4 sm:$0xff]   ;;  %v927_v25 = vadd.f32 %v923_v21, %v919_v19  ;;  %v928_v26 = vadd.f32 %v924_v22, %v920_v20  ;;  %v921_v27 = vld [vmem:[#allocation2 + $0x18] sm:$0xff]  ;;  %v1094_v38 = vpack.c.bf16 %v920_v20, %v919_v19  ;;  %vm1223_vm1 = vcmask 261120  }
 0x10e   : > { %1045 = vmatprep.subr.bf16.mxu0 %v3738_v9  ;;  %v922_v28 = vld [vmem:[#allocation2 + $0x8] sm:$0xff]  ;;  %v925_v29 = vld [vmem:[#allocation6 + $0x10] sm:$0xff]  ;;  %v926_v30 = vld [vmem:[#allocation6 + $0x18] sm:$0xff]  ;;  %v953_v48 = vsub.s32 0, %v4696_v47  ;;  %v957_v49 = vsub.s32 1, %v4696_v47  ;;  %s4211_s6 = smov 64  }
 0x10f   : > { %v931_v31 = vpack.c.bf16 %v928_v26, %v927_v25  ;;  %v929_v32 = vadd.f32 %v925_v29, %v921_v27  ;;  %v930_v33 = vadd.f32 %v926_v30, %v922_v28  ;;  %v3756_v36 = vld [vmem:[%s4653_s11 + $0x38] sm:$0xff]   ;;  %v3757_v37 = vld [vmem:[%s4653_s11 + $0x30] sm:$0xff]   ;;  %3478 = vmatprep.mubr.bf16.mxu1 %v1094_v38  ;;  %v3758_v39 = vld [vmem:[%s4653_s11 + $0x28] sm:$0xff]   ;;  %v1095_v45 = vpack.c.bf16 %v922_v28, %v921_v27  ;;  %s4212_s23 = smov 96   ;;  %s4213_s22 = smov 32  }
 0x110   : > { %3462 = vmatprep.subr.bf16.mxu1 %v3756_v36  ;;  %v3759_v40 = vld [vmem:[%s4653_s11 + $0x20] sm:$0xff]   ;;  %v3760_v41 = vld [vmem:[%s4653_s11 + $0x18] sm:$0xff]   ;;  %v3761_v42 = vld [vmem:[%s4653_s11 + $0x10] sm:$0xff]   ;;  %vm1271_vm2 = vcmask 130048   ;;  %vm1755_vm3 = vcmask 523264   ;;  %vm1758_vm4 = vcmask 785408  }
 0x111   : > { %1046 = vmatpush1.bf16.msra.mxu0 %v3740_v10  ;;  %v932_v34 = vpack.c.bf16 %v930_v33, %v929_v32  ;;  %3463 = vmatpush3.bf16.msra.mxu1 %v3756_v36  ;;  %v3762_v43 = vld [vmem:[%s4653_s11 + $0x8] sm:$0xff]   ;;  %v3763_v44 = vld [vmem:[%s4653_s11] sm:$0xff]   ;;  %s5225_s7 = sld [smem:[#allocation32_spill]]  ;;  %p3370_p10 = scmp.ne.s32.totalorder %s4331_s0, 1 }
 0x112   : > { %1047 = vmatprep.subr.bf16.mxu0 %v3741_v11  ;;  %3464 = vmatprep.subr.bf16.mxu1 %v3757_v37  ;;  %v949_v50 = vld [vmem:[%s4626_s26] sm:$0x3]  ;;  %s5223_s26 = sld [smem:[#allocation31_spill]] }
 0x113   : > { %v954_v53 = vrot.slane %v949_v50, %v953_v48  ;;  %v958_v54 = vrot.slane %v949_v50, %v957_v49 }
 0x115   : > { %1048 = vmatpush1.bf16.msra.mxu0 %v3743_v12  ;;  %3465 = vmatpush3.bf16.msra.mxu1 %v3757_v37 }
 0x116   : > { %1049 = vmatprep.subr.bf16.mxu0 %v3744_v13  ;;  %3466 = vmatprep.subr.bf16.mxu1 %v3758_v39 }
 0x117   : > { %s5226_s30 = scalar_lea.vmem %s5225_s7, %s4616_s25 }
 0x118   : > { %s5224_s11 = scalar_lea.vmem %s5223_s26, %s4616_s25 }
 0x119   : > { %1050 = vmatpush1.bf16.msra.mxu0 %v3746_v14  ;;  %3467 = vmatpush3.bf16.msra.mxu1 %v3758_v39 }
 0x11a   : > { %1051 = vmatprep.subr.bf16.mxu0 %v3747_v15  ;;  %3468 = vmatprep.subr.bf16.mxu1 %v3759_v40 }
 0x11d   : > { %1052 = vmatpush1.bf16.msra.mxu0 %v3749_v16  ;;  %3469 = vmatpush3.bf16.msra.mxu1 %v3759_v40 }
 0x11e   : > { %1053 = vmatprep.subr.bf16.mxu0 %v3750_v17  ;;  %3470 = vmatprep.subr.bf16.mxu1 %v3760_v41  ;;  %v3299_v17 = vld [vmem:[%s755_s17] ss:$0 sm:$0xff] }
 0x121   : > { %1054 = vmatpush1.bf16.msra.mxu0 %v3752_v18  ;;  %3471 = vmatpush3.bf16.msra.mxu1 %v3760_v41 }
 0x122   : > { %1055 = vmatprep.subr.bf16.mxu0 %v3753_v23  ;;  %3472 = vmatprep.subr.bf16.mxu1 %v3761_v42 }
 0x125   : > { %1056 = vmatpush1.bf16.msra.mxu0 %v3755_v24  ;;  %3473 = vmatpush3.bf16.msra.mxu1 %v3761_v42 }
 0x126   : > { %3482 = vmatprep.subr.bf16.mxu0 %v4209_v35  ;;  %3474 = vmatprep.subr.bf16.mxu1 %v3762_v43 }
 0x128   : > { %1074 = vmatmul.mubr.bf16.vlgmr.msra.gmra.mxu0 %v931_v31 }
 0x129   : > { %1083 = vmatprep.mubr.bf16.mxu0 %v4208_v6  ;;  %3475 = vmatpush3.bf16.msra.mxu1 %v3762_v43 }
 0x12a   : > { %3476 = vmatprep.subr.bf16.mxu1 %v3763_v44 }
 0x12d   : > { %3477 = vmatpush3.bf16.msra.mxu1 %v3763_v44 }
 0x12e   : > { %3494 = vmatprep.subr.bf16.mxu1 %v4209_v35 }
 0x130   : > { %1084 = vmatmul.mubr.bf16.gmra.mxu0 %v932_v34  ;;  %3479 = vmatmul.mubr.bf16.vlgmr.msra.gmra.mxu1 %v1095_v45 }
 0x131   : > { %3484 = vmatprep.mubr.msk.bf16.mxu0 %vm4210_vm0, %v4209_v35  ;;  %3496 = vmatprep.mubr.msk.bf16.mxu1 %vm4210_vm0, %v4209_v35 }
 0x1e8   : > { %v1075_v51 = vpop.f32.mrf.mxu0 }
 0x1e9   : > { %v1076_v58 = vadd.f32 %v1075_v51, %v954_v53 }
 0x1ea   : > { %v1077_v52 = vpop.f32.mrf.mxu0 }
 0x1eb   : > { %v1078_v59 = vadd.f32 %v1077_v52, %v958_v54  ;;  %v1216_v1 = vmul.f32 0.17677669, %v1076_v58 }
 0x1ec   : > { %v1079_v55 = vpop.f32.mrf.mxu0 }
 0x1ed   : > { %v1080_v56 = vadd.f32 %v1079_v55, %v954_v53 }
 0x1ee   : > { %v1081_v57 = vpop.f32.mrf.mxu0 }
 0x1ef   : > { %v1082_v60 = vadd.f32 %v1081_v57, %v958_v54  ;;  %v1217_v62 = vmul.f32 0.17677669, %v1080_v56 }
 0x1f0   : > { %v1085_v61 = vpop.f32.mrf.mxu0  ;;  %v3480_v18 = vpop.f32.mrf.mxu1 }
 0x1f1   : > { %v1221_v63 = vpack.c.bf16 %v1082_v60, %v1078_v59  ;;  %v1086_v3 = vadd.f32 %v1085_v61, %v954_v53  ;;  %v1220_v5 = vpack.c.bf16 %v1217_v62, %v1216_v1  ;;  %v1210_v20 = vadd.f32 %v3480_v18, %v3299_v17 }
 0x1f2   : > { %v1087_v0 = vpop.f32.mrf.mxu0  ;;  %v1201_v21 = vpop.f32.mrf.mxu1 }
 0x1f3   : > { %1477 = vrot.lane.b32.xlu1 %v1221_v63, %s4211_s6  ;;  %1349 = vrot.lane.b32.xlu0 %v1221_v63, %s4212_s23  ;;  %v1228_v2 = vsel %vm1223_vm1, %v1221_v63, 0  ;;  %v1218_v9 = vmul.f32 0.17677669, %v1086_v3  ;;  %v1088_v10 = vadd.f32 %v1087_v0, %v958_v54  ;;  %v1202_v25 = vadd.f32 %v3299_v17, %v1201_v21 }
 0x1f4   : > { %3483 = vmatpush3.bf16.xpose.msra.mxu0 %v1228_v2  ;;  %v1089_v4 = vpop.f32.mrf.mxu0  ;;  %v3481_v24 = vpop.f32.mrf.mxu1 }
 0x1f5   : > { %v1090_v7 = vadd.f32 %v1089_v4, %v954_v53  ;;  %3488 = vmatprep.subr.bf16.mxu0 %v4209_v35  ;;  %v1213_v26 = vadd.f32 %v3481_v24, %v3299_v17 }
 0x1f6   : > { %v1091_v8 = vpop.f32.mrf.mxu0  ;;  %v1204_v27 = vpop.f32.mrf.mxu1 }
 0x1f7   : > { %1475 = vrot.lane.b32.xlu1 %v1220_v5, %s4211_s6  ;;  %1346 = vrot.lane.b32.xlu0 %v1220_v5, %s4212_s23  ;;  %v1219_v11 = vmul.f32 0.17677669, %v1090_v7  ;;  %v1092_v12 = vadd.f32 %v1091_v8, %v958_v54  ;;  %v4731_v28 = vpack.c.bf16 %v1213_v26, %v1210_v20  ;;  %v1205_v29 = vadd.f32 %v3299_v17, %v1204_v27 }
 0x1f9   : > { %v1761_v13 = vpack.c.bf16 %v1219_v11, %v1218_v9  ;;  %v1762_v14 = vpack.c.bf16 %v1092_v12, %v1088_v10  ;;  %v4733_v31 = vpack.c.bf16 %v1205_v29, %v1202_v25 }
 0x1fb   : > { %1602 = vrot.lane.b32.xlu1 %v1220_v5, %s4213_s22  ;;  %1604 = vrot.lane.b32.xlu0 %v1221_v63, %s4213_s22  ;;  %v1768_v36 = vsel %vm1223_vm1, %v1762_v14, 0 }
 0x1fc   : > { %3485 = vmatmul.mubr.msk.bf16.vlgmr.msra.gmra.mxu0 %vm1223_vm1, %v1220_v5 }
 0x1fd   : > { %3490 = vmatprep.mubr.msk.bf16.mxu0 %vm4210_vm0, %v4209_v35  ;;  %3489 = vmatpush3.bf16.msra.mxu0 %v4733_v31 }
 0x1fe   : > { %3500 = vmatprep.subr.bf16.mxu0 %v4209_v35 }
 0x1ff   : > { %1888 = vrot.lane.b32.xlu0 %v1762_v14, %s4212_s23  ;;  %1885 = vrot.lane.b32.xlu1 %v1761_v13, %s4212_s23 }
 0x203   : > { %2016 = vrot.lane.b32.xlu0 %v1762_v14, %s4211_s6  ;;  %2014 = vrot.lane.b32.xlu1 %v1761_v13, %s4211_s6 }
 0x207   : > { %2143 = vrot.lane.b32.xlu0 %v1762_v14, %s4213_s22  ;;  %2141 = vrot.lane.b32.xlu1 %v1761_v13, %s4213_s22 }
 0x265   : > { %v1350_v15 = vpop.permute.xlu0 %1349  ;;  %v1478_v19 = vpop.permute.xlu1 %1477 }
 0x266   : > { %v1355_v16 = vsel %vm1223_vm1, %v1350_v15, 0  ;;  %v1483_v23 = vsel %vm1223_vm1, %v1478_v19, 0 }
 0x267   : > { %3495 = vmatpush3.bf16.xpose.msra.mxu1 %v1355_v16 }
 0x268   : > { %3506 = vmatprep.subr.bf16.mxu1 %v4209_v35 }
 0x269   : > { %v1347_v22 = vpop.permute.xlu0 %1346  ;;  %v1476_v32 = vpop.permute.xlu1 %1475 }
 0x26d   : > { %v1605_v30 = vpop.permute.xlu0 %1604  ;;  %v1603_v34 = vpop.permute.xlu1 %1602 }
 0x26e   : > { %3497 = vmatmul.mubr.msk.bf16.vlgmr.msra.gmra.mxu1 %vm1223_vm1, %v1347_v22  ;;  %v1610_v33 = vsel %vm1223_vm1, %v1605_v30, 0 }
 0x26f   : > { %3507 = vmatpush3.bf16.xpose.msra.mxu1 %v1483_v23  ;;  %3508 = vmatprep.mubr.msk.bf16.mxu1 %vm4210_vm0, %v4209_v35 }
 0x270   : > { %3518 = vmatprep.subr.bf16.mxu1 %v4209_v35 }
 0x271   : > { %v1889_v37 = vpop.permute.xlu0 %1888  ;;  %v1886_v39 = vpop.permute.xlu1 %1885 }
 0x272   : > { %v1894_v38 = vsel %vm1223_vm1, %v1889_v37, 0 }
 0x275   : > { %v2017_v40 = vpop.permute.xlu0 %2016  ;;  %v2015_v43 = vpop.permute.xlu1 %2014 }
 0x276   : > { %3509 = vmatmul.mubr.msk.bf16.vlgmr.msra.gmra.mxu1 %vm1223_vm1, %v1476_v32  ;;  %v2022_v41 = vsel %vm1223_vm1, %v2017_v40, 0 }
 0x277   : > { %3519 = vmatpush3.bf16.xpose.msra.mxu1 %v1610_v33  ;;  %3520 = vmatprep.mubr.msk.bf16.mxu1 %vm4210_vm0, %v4209_v35 }
 0x278   : > { %3530 = vmatprep.subr.bf16.mxu1 %v4209_v35 }
 0x279   : > { %v2144_v42 = vpop.permute.xlu0 %2143  ;;  %v2142_v45 = vpop.permute.xlu1 %2141 }
 0x27a   : > { %v2149_v44 = vsel %vm1223_vm1, %v2144_v42, 0 }
 0x27e   : > { %3521 = vmatmul.mubr.msk.bf16.vlgmr.msra.gmra.mxu1 %vm1223_vm1, %v1603_v34 }
 0x27f   : > { %3531 = vmatpush3.bf16.xpose.msra.mxu1 %v1768_v36  ;;  %3532 = vmatprep.mubr.msk.bf16.mxu1 %vm4210_vm0, %v4209_v35 }
 0x280   : > { %3542 = vmatprep.subr.bf16.mxu1 %v4209_v35 }
 0x286   : > { %3533 = vmatmul.mubr.msk.bf16.vlgmr.msra.gmra.mxu1 %vm1223_vm1, %v1761_v13 }
 0x287   : > { %3543 = vmatpush3.bf16.xpose.msra.mxu1 %v1894_v38  ;;  %3544 = vmatprep.mubr.msk.bf16.mxu1 %vm4210_vm0, %v4209_v35 }
 0x288   : > { %3554 = vmatprep.subr.bf16.mxu1 %v4209_v35 }
 0x28e   : > { %3545 = vmatmul.mubr.msk.bf16.vlgmr.msra.gmra.mxu1 %vm1223_vm1, %v1886_v39 }
 0x28f   : > { %3555 = vmatpush3.bf16.xpose.msra.mxu1 %v2022_v41  ;;  %3556 = vmatprep.mubr.msk.bf16.mxu1 %vm4210_vm0, %v4209_v35 }
 0x290   : > { %3566 = vmatprep.subr.bf16.mxu1 %v4209_v35 }
 0x296   : > { %3557 = vmatmul.mubr.msk.bf16.vlgmr.msra.gmra.mxu1 %vm1223_vm1, %v2015_v43 }
 0x297   : > { %3567 = vmatpush3.bf16.xpose.msra.mxu1 %v2149_v44  ;;  %3568 = vmatprep.mubr.msk.bf16.mxu1 %vm4210_vm0, %v4209_v35 }
 0x29e   : > { %3569 = vmatmul.mubr.msk.bf16.vlgmr.msra.gmra.mxu1 %vm1223_vm1, %v2142_v45 }
 0x2bc   : > { %v1264_v46 = vpop.f32.mrf.mxu0 }
 0x2bd   : > { %v1272_v50 = vsel %vm1271_vm2, %v1264_v46, -inf }
 0x2be   : > { %1273 = vmax.xlane.f32.xlu0 %v1272_v50  ;;  %v3486_v51 = vpop.f32.mrf.mxu0 }
 0x2c0   : > { %v1267_v52 = vpop.f32.mrf.mxu0 }
 0x2c1   : > { %v1275_v53 = vsel %vm1271_vm2, %v1267_v52, -inf }
 0x2c2   : > { %1276 = vmax.xlane.f32.xlu1 %v1275_v53  ;;  %v3487_v54 = vpop.f32.mrf.mxu0 }
 0x32e   : > { %v4764_v55 = vpop.f32.mrf.mxu1 }
 0x32f   : > { %v1398_v56 = vsel %vm1271_vm2, %v4764_v55, -inf }
 0x330   : > { %v3498_v57 = vpop.f32.mrf.mxu1  ;;  %1399 = vmax.xlane.f32.xlu0 %v1398_v56 }
 0x332   : > { %v4768_v58 = vpop.f32.mrf.mxu1 }
 0x333   : > { %v1401_v59 = vsel %vm1271_vm2, %v4768_v58, -inf }
 0x334   : > { %v3499_v60 = vpop.f32.mrf.mxu1  ;;  %1402 = vmax.xlane.f32.xlu0 %v1401_v59 }
 0x336   : > { %v4772_v61 = vpop.f32.mrf.mxu1 }
 0x337   : > { %v1526_v62 = vsel %vm1271_vm2, %v4772_v61, -inf }
 0x338   : > { %v3510_v63 = vpop.f32.mrf.mxu1  ;;  %1527 = vmax.xlane.f32.xlu1 %v1526_v62 }
 0x33a   : > { %v4776_v0 = vpop.f32.mrf.mxu1 }
 0x33b   : > { %v1529_v1 = vsel %vm1271_vm2, %v4776_v0, -inf }
 0x33c   : > { %v3511_v2 = vpop.f32.mrf.mxu1  ;;  %1530 = vmax.xlane.f32.xlu0 %v1529_v1 }
 0x33e   : > { %v4780_v3 = vpop.f32.mrf.mxu1 }
 0x33f   : > { %v1653_v4 = vsel %vm1271_vm2, %v4780_v3, -inf }
 0x340   : > { %v3522_v5 = vpop.f32.mrf.mxu1  ;;  %1654 = vmax.xlane.f32.xlu1 %v1653_v4 }
 0x342   : > { %v4784_v7 = vpop.f32.mrf.mxu1 }
 0x343   : > { %v1656_v8 = vsel %vm1271_vm2, %v4784_v7, -inf }
 0x344   : > { %v3523_v9 = vpop.f32.mrf.mxu1  ;;  %1657 = vmax.xlane.f32.xlu0 %v1656_v8 }
 0x346   : > { %v4788_v10 = vpop.f32.mrf.mxu1 }
 0x347   : > { %v1274_v11 = vpop.xlane.xlu0 %1273  ;;  %v1811_v12 = vsel %vm1271_vm2, %v4788_v10, -inf }
 0x348   : > { %v1278_v13 = vsub.f32 %v1264_v46, %v1274_v11  ;;  %v3534_v14 = vpop.f32.mrf.mxu1  ;;  %1812 = vmax.xlane.f32.xlu1 %v1811_v12 }
 0x34a   : > { %v1280_v15 = vmul.f32 1.442695, %v1278_v13  ;;  %v4792_v16 = vpop.f32.mrf.mxu1 }
 0x34b   : > { %v1277_v17 = vpop.xlane.xlu1 %1276  ;;  %v1814_v18 = vsel %vm1271_vm2, %v4792_v16, -inf }
 0x34c   : > { %3812 = vpow2.f32 %v1280_v15  ;;  %v1279_v19 = vsub.f32 %v1267_v52, %v1277_v17  ;;  %v3535_v20 = vpop.f32.mrf.mxu1  ;;  %1815 = vmax.xlane.f32.xlu0 %v1814_v18 }
 0x34e   : > { %v1282_v21 = vmul.f32 1.442695, %v1279_v19  ;;  %v4796_v22 = vpop.f32.mrf.mxu1 }
 0x34f   : > { %v1937_v23 = vsel %vm1271_vm2, %v4796_v22, -inf }
 0x350   : > { %3814 = vpow2.f32 %v1282_v21  ;;  %v3546_v24 = vpop.f32.mrf.mxu1  ;;  %1938 = vmax.xlane.f32.xlu1 %v1937_v23 }
 0x352   : > { %v4800_v25 = vpop.f32.mrf.mxu1 }
 0x353   : > { %v1940_v26 = vsel %vm1271_vm2, %v4800_v25, -inf }
 0x354   : > { %v3547_v27 = vpop.f32.mrf.mxu1  ;;  %1941 = vmax.xlane.f32.xlu0 %v1940_v26 }
 0x356   : > { %v4804_v29 = vpop.f32.mrf.mxu1 }
 0x357   : > { %v2065_v30 = vsel %vm1271_vm2, %v4804_v29, -inf }
 0x358   : > { %v3558_v32 = vpop.f32.mrf.mxu1  ;;  %2066 = vmax.xlane.f32.xlu1 %v2065_v30 }
 0x359   : > { %v4808_v33 = vpop.eup %3812 }
 0x35a   : > { %v4810_v34 = vpop.f32.mrf.mxu1  ;;  %v1284_v37 = vsel %vm1271_vm2, %v4808_v33, 0.0 }
 0x35b   : > { %v2068_v36 = vsel %vm1271_vm2, %v4810_v34, -inf }
 0x35c   : > { %v3559_v38 = vpop.f32.mrf.mxu1  ;;  %2069 = vmax.xlane.f32.xlu0 %v2068_v36  ;;  %1285 = vadd.xlane.f32.xlu1 %v1284_v37 }
 0x35d   : > { %v4816_v39 = vpop.eup %3814 }
 0x35e   : > { %v4818_v40 = vpop.f32.mrf.mxu1  ;;  %v1287_v42 = vsel %vm1271_vm2, %v4816_v39, 0.0 }
 0x35f   : > { %v2192_v41 = vsel %vm1271_vm2, %v4818_v40, -inf }
 0x360   : > { %v3570_v43 = vpop.f32.mrf.mxu1  ;;  %2193 = vmax.xlane.f32.xlu1 %v2192_v41  ;;  %1288 = vadd.xlane.f32.xlu0 %v1287_v42 }
 0x362   : > { %v4824_v44 = vpop.f32.mrf.mxu1 }
 0x363   : > { %v2195_v45 = vsel %vm1271_vm2, %v4824_v44, -inf }
 0x364   : > { %v3571_v46 = vpop.f32.mrf.mxu1  ;;  %2196 = vmax.xlane.f32.xlu0 %v2195_v45 }
 0x371   : > { %1428 = vrot.lane.b32.xlu1 %v4733_v31, %s4212_s23 }
 0x3b9   : > { %v1400_v50 = vpop.xlane.xlu0 %1399 }
 0x3ba   : > { %v1404_v51 = vsub.f32 %v4764_v55, %v1400_v50 }
 0x3bc   : > { %v1406_v52 = vmul.f32 1.442695, %v1404_v51 }
 0x3bd   : > { %v1403_v53 = vpop.xlane.xlu0 %1402 }
 0x3be   : > { %3816 = vpow2.f32 %v1406_v52  ;;  %v1405_v54 = vsub.f32 %v4768_v58, %v1403_v53 }
 0x3c0   : > { %v1408_v56 = vmul.f32 1.442695, %v1405_v54 }
 0x3c1   : > { %v1528_v57 = vpop.xlane.xlu1 %1527 }
 0x3c2   : > { %3818 = vpow2.f32 %v1408_v56  ;;  %v1532_v59 = vsub.f32 %v4772_v61, %v1528_v57 }
 0x3c4   : > { %v1534_v60 = vmul.f32 1.442695, %v1532_v59 }
 0x3c5   : > { %v1531_v62 = vpop.xlane.xlu0 %1530 }
 0x3c6   : > { %3820 = vpow2.f32 %v1534_v60  ;;  %v1533_v63 = vsub.f32 %v4776_v0, %v1531_v62 }
 0x3c8   : > { %v1536_v1 = vmul.f32 1.442695, %v1533_v63 }
 0x3c9   : > { %v1655_v2 = vpop.xlane.xlu1 %1654 }
 0x3ca   : > { %3822 = vpow2.f32 %v1536_v1  ;;  %v1659_v55 = vsub.f32 %v4780_v3, %v1655_v2 }
 0x3cb   : > { %v4835_v4 = vpop.eup %3816 }
 0x3cc   : > { %v1661_v5 = vmul.f32 1.442695, %v1659_v55  ;;  %v1410_v58 = vsel %vm1271_vm2, %v4835_v4, 0.0 }
 0x3cd   : > { %1411 = vadd.xlane.f32.xlu1 %v1410_v58  ;;  %v1658_v15 = vpop.xlane.xlu0 %1657 }
 0x3ce   : > { %3824 = vpow2.f32 %v1661_v5  ;;  %v1660_v41 = vsub.f32 %v4784_v7, %v1658_v15 }
 0x3cf   : > { %v4839_v8 = vpop.eup %3818 }
 0x3d0   : > { %v1413_v61 = vsel %vm1271_vm2, %v4839_v8, 0.0  ;;  %v1663_v46 = vmul.f32 1.442695, %v1660_v41 }
 0x3d1   : > { %1414 = vadd.xlane.f32.xlu0 %v1413_v61  ;;  %v1813_v0 = vpop.xlane.xlu1 %1812 }
 0x3d2   : > { %v1817_v9 = vsub.f32 %v4788_v10, %v1813_v0 }
 0x3d3   : > { %v4844_v11 = vpop.eup %3820 }
 0x3d4   : > { %v1819_v3 = vmul.f32 1.442695, %v1817_v9  ;;  %v1538_v12 = vsel %vm1271_vm2, %v4844_v11, 0.0 }
 0x3d5   : > { %1539 = vadd.xlane.f32.xlu1 %v1538_v12  ;;  %v1816_v21 = vpop.xlane.xlu0 %1815 }
 0x3d6   : > { %3826 = vpow2.f32 %v1819_v3  ;;  %v1818_v50 = vsub.f32 %v4792_v16, %v1816_v21 }
 0x3d7   : > { %v4848_v13 = vpop.eup %3822 }
 0x3d8   : > { %v1541_v14 = vsel %vm1271_vm2, %v4848_v13, 0.0  ;;  %v1821_v54 = vmul.f32 1.442695, %v1818_v50 }
 0x3d9   : > { %1542 = vadd.xlane.f32.xlu0 %v1541_v14  ;;  %v1939_v17 = vpop.xlane.xlu1 %1938 }
 0x3da   : > { %v1943_v18 = vsub.f32 %v4796_v22, %v1939_v17 }
 0x3db   : > { %v4853_v19 = vpop.eup %3824 }
 0x3dc   : > { %v1945_v10 = vmul.f32 1.442695, %v1943_v18  ;;  %v1665_v20 = vsel %vm1271_vm2, %v4853_v19, 0.0 }
 0x3dd   : > { %1666 = vadd.xlane.f32.xlu1 %v1665_v20  ;;  %v1942_v23 = vpop.xlane.xlu0 %1941 }
 0x3de   : > { %3828 = vpow2.f32 %v1945_v10  ;;  %v1944_v56 = vsub.f32 %v4800_v25, %v1942_v23 }
 0x3e0   : > { %v1947_v62 = vmul.f32 1.442695, %v1944_v56 }
 0x3e1   : > { %v2067_v24 = vpop.xlane.xlu1 %2066 }
 0x3e2   : > { %v2071_v16 = vsub.f32 %v4804_v29, %v2067_v24 }
 0x3e3   : > { %v4857_v26 = vpop.eup %3826 }
 0x3e4   : > { %v1823_v27 = vsel %vm1271_vm2, %v4857_v26, 0.0  ;;  %v2073_v25 = vmul.f32 1.442695, %v2071_v16 }
 0x3e5   : > { %v2070_v30 = vpop.xlane.xlu0 %2069  ;;  %1824 = vadd.xlane.f32.xlu1 %v1823_v27  ;;  %v1286_v32 = vpop.xlane.xlu1 %1285 }
 0x3e6   : > { %3830 = vrcp.f32 %v1286_v32 }
 0x3e9   : > { %v1289_v22 = vpop.xlane.xlu0 %1288  ;;  %v2194_v59 = vpop.xlane.xlu1 %2193 }
 0x3ea   : > { %3832 = vrcp.f32 %v1289_v22 }
 0x3eb   : > { %v4861_v36 = vpop.eup %3828  ;;  %3834 = vpow2.f32 %v1663_v46 }
 0x3ec   : > { %v1949_v37 = vsel %vm1271_vm2, %v4861_v36, 0.0  ;;  %3836 = vpow2.f32 %v1821_v54 }
 0x3ed   : > { %1950 = vadd.xlane.f32.xlu1 %v1949_v37  ;;  %v1429_v1 = vpop.permute.xlu1 %1428  ;;  %3838 = vpow2.f32 %v1947_v62 }
 0x3ee   : > { %3840 = vpow2.f32 %v2073_v25 }
 0x3ef   : > { %1555 = vrot.lane.b32.xlu0 %v4733_v31, %s4211_s6 }
 0x3f3   : > { %v3831_v38 = vpop.eup %3830 }
 0x3f4   : > { %v1292_v42 = vmul.f32 %v3831_v38, %v1286_v32 }
 0x3f6   : > { %v1294_v43 = vsub.f32 2.0, %v1292_v42 }
 0x3f7   : > { %v3833_v45 = vpop.eup %3832 }
 0x3f8   : > { %v1293_v51 = vmul.f32 %v3833_v45, %v1289_v22  ;;  %v1296_v52 = vmul.f32 %v3831_v38, %v1294_v43  ;;  %v4882_v55 = vpop.eup %3834 }
 0x3f9   : > { %v1668_v61 = vsel %vm1271_vm2, %v4882_v55, 0.0  ;;  %v4886_v0 = vpop.eup %3836 }
 0x3fa   : > { %v1295_v53 = vsub.f32 2.0, %v1293_v51  ;;  %v1298_v7 = vmul.f32 %v4808_v33, %v1296_v52  ;;  %v2197_v33 = vpop.xlane.xlu0 %2196 }
 0x3fb   : > { %v2199_v29 = vsub.f32 %v4824_v44, %v2197_v33 }
 0x3fc   : > { %v1297_v57 = vmul.f32 %v3833_v45, %v1295_v53 }
 0x3fd   : > { %v2202_v58 = vmul.f32 1.442695, %v2199_v29 }
 0x3fe   : > { %1682 = vrot.lane.b32.xlu1 %v4733_v31, %s4213_s22  ;;  %v1299_v60 = vmul.f32 %v4816_v39, %v1297_v57  ;;  %v2072_v31 = vsub.f32 %v4810_v34, %v2070_v30  ;;  %v2198_v39 = vsub.f32 %v4818_v40, %v2194_v59  ;;  %v1826_v34 = vsel %vm1271_vm2, %v4886_v0, 0.0  ;;  %v4890_v40 = vpop.eup %3838 }
 0x3ff   : > { %v1952_v44 = vsel %vm1271_vm2, %v4890_v40, 0.0  ;;  %v4894_v9 = vpop.eup %3840 }
 0x400   : > { %v1300_v63 = vpack.c.bf16 %v1299_v60, %v1298_v7  ;;  %v2075_v2 = vmul.f32 1.442695, %v2072_v31  ;;  %v2200_v5 = vmul.f32 1.442695, %v2198_v39  ;;  %v2077_v3 = vsel %vm1271_vm2, %v4894_v9, 0.0 }
 0x402   : > { %3491 = vmatmul.mubr.msk.bf16.vlgmr.msra.gmra.mxu0 %vm1271_vm2, %v1300_v63  ;;  %3842 = vpow2.f32 %v2075_v2 }
 0x403   : > { %3501 = vmatpush3.bf16.msra.mxu0 %v1429_v1  ;;  %3502 = vmatprep.mubr.msk.bf16.mxu0 %vm4210_vm0, %v4209_v35  ;;  %3844 = vpow2.f32 %v2200_v5 }
 0x404   : > { %3512 = vmatprep.subr.bf16.mxu0 %v4209_v35  ;;  %3846 = vpow2.f32 %v2202_v58 }
 0x40e   : > { %1669 = vadd.xlane.f32.xlu0 %v1668_v61 }
 0x40f   : > { %v4898_v12 = vpop.eup %3842 }
 0x410   : > { %v4900_v14 = vpop.eup %3844  ;;  %v2080_v15 = vsel %vm1271_vm2, %v4898_v12, 0.0 }
 0x411   : > { %v4904_v17 = vpop.eup %3846  ;;  %v2204_v10 = vsel %vm1271_vm2, %v4900_v14, 0.0 }
 0x412   : > { %1827 = vadd.xlane.f32.xlu0 %v1826_v34  ;;  %v2207_v18 = vsel %vm1271_vm2, %v4904_v17, 0.0 }
 0x416   : > { %1953 = vadd.xlane.f32.xlu0 %v1952_v44 }
 0x41a   : > { %2078 = vadd.xlane.f32.xlu0 %v2077_v3 }
 0x41e   : > { %2081 = vadd.xlane.f32.xlu0 %v2080_v15 }
 0x422   : > { %2208 = vadd.xlane.f32.xlu0 %v2207_v18  ;;  %2205 = vadd.xlane.f32.xlu1 %v2204_v10 }
 0x433   : > { %2094 = vrot.lane.b32.xlu1 %v4731_v28, %s4211_s6 }
 0x437   : > { %2221 = vrot.lane.b32.xlu1 %v4731_v28, %s4213_s22 }
 0x438   : > { %1967 = vrot.lane.b32.xlu0 %v4731_v28, %s4212_s23 }
 0x456   : > { %v1412_v20 = vpop.xlane.xlu1 %1411 }
 0x457   : > { %3848 = vrcp.f32 %v1412_v20 }
 0x45a   : > { %v1415_v21 = vpop.xlane.xlu0 %1414 }
 0x45b   : > { %3850 = vrcp.f32 %v1415_v21 }
 0x45e   : > { %v1540_v23 = vpop.xlane.xlu1 %1539 }
 0x45f   : > { %3852 = vrcp.f32 %v1540_v23 }
 0x462   : > { %v1543_v24 = vpop.xlane.xlu0 %1542 }
 0x463   : > { %3854 = vrcp.f32 %v1543_v24 }
 0x464   : > { %v3849_v27 = vpop.eup %3848 }
 0x465   : > { %v1418_v30 = vmul.f32 %v3849_v27, %v1412_v20 }
 0x466   : > { %v1667_v46 = vpop.xlane.xlu1 %1666  ;;  %v1556_v60 = vpop.permute.xlu0 %1555 }
 0x467   : > { %v1420_v32 = vsub.f32 2.0, %v1418_v30  ;;  %3856 = vrcp.f32 %v1667_v46 }
 0x468   : > { %v3851_v22 = vpop.eup %3850 }
 0x469   : > { %v1419_v37 = vmul.f32 %v3851_v22, %v1415_v21  ;;  %v1422_v38 = vmul.f32 %v3849_v27, %v1420_v32 }
 0x46b   : > { %v1421_v41 = vsub.f32 2.0, %v1419_v37  ;;  %v1424_v50 = vmul.f32 %v4835_v4, %v1422_v38 }
 0x46c   : > { %v3853_v42 = vpop.eup %3852 }
 0x46d   : > { %v1423_v43 = vmul.f32 %v3851_v22, %v1421_v41  ;;  %v1546_v45 = vmul.f32 %v3853_v42, %v1540_v23 }
 0x46e   : > { %v1825_v57 = vpop.xlane.xlu1 %1824 }
 0x46f   : > { %v1425_v51 = vmul.f32 %v4839_v8, %v1423_v43  ;;  %v1548_v52 = vsub.f32 2.0, %v1546_v45  ;;  %3858 = vrcp.f32 %v1825_v57 }
 0x470   : > { %v3855_v53 = vpop.eup %3854 }
 0x471   : > { %v1426_v54 = vpack.c.bf16 %v1425_v51, %v1424_v50  ;;  %v1547_v56 = vmul.f32 %v3855_v53, %v1543_v24  ;;  %v1550_v59 = vmul.f32 %v3853_v42, %v1548_v52 }
 0x473   : > { %v1549_v7 = vsub.f32 2.0, %v1547_v56  ;;  %3503 = vmatmul.mubr.msk.bf16.vlgmr.msra.gmra.mxu0 %vm1271_vm2, %v1426_v54  ;;  %v1552_v8 = vmul.f32 %v4844_v11, %v1550_v59 }
 0x474   : > { %3513 = vmatpush3.bf16.msra.mxu0 %v1556_v60  ;;  %3514 = vmatprep.mubr.msk.bf16.mxu0 %vm4210_vm0, %v4209_v35  ;;  %v3857_v33 = vpop.eup %3856 }
 0x475   : > { %v1551_v62 = vmul.f32 %v3855_v53, %v1549_v7  ;;  %3524 = vmatprep.subr.bf16.mxu0 %v4209_v35 }
 0x476   : > { %v1951_v4 = vpop.xlane.xlu1 %1950 }
 0x477   : > { %v1553_v16 = vmul.f32 %v4848_v13, %v1551_v62  ;;  %v1673_v13 = vmul.f32 %v3857_v33, %v1667_v46 }
 0x479   : > { %v1554_v63 = vpack.c.bf16 %v1553_v16, %v1552_v8  ;;  %v1675_v29 = vsub.f32 2.0, %v1673_v13 }
 0x47a   : > { %v1683_v1 = vpop.permute.xlu1 %1682 }
 0x47b   : > { %3515 = vmatmul.mubr.msk.bf16.vlgmr.msra.gmra.mxu0 %vm1271_vm2, %v1554_v63  ;;  %v1677_v34 = vmul.f32 %v3857_v33, %v1675_v29 }
 0x47c   : > { %3525 = vmatpush3.bf16.msra.mxu0 %v1683_v1  ;;  %3526 = vmatprep.mubr.msk.bf16.mxu0 %vm4210_vm0, %v4209_v35  ;;  %v3859_v2 = vpop.eup %3858 }
 0x47d   : > { %3536 = vmatprep.subr.bf16.mxu0 %v4209_v35  ;;  %v1831_v44 = vmul.f32 %v3859_v2, %v1825_v57  ;;  %v1679_v24 = vmul.f32 %v4853_v19, %v1677_v34 }
 0x47f   : > { %v1833_v27 = vsub.f32 2.0, %v1831_v44 }
 0x481   : > { %v1835_v42 = vmul.f32 %v3859_v2, %v1833_v27  ;;  %v3766_v27 = vld [vmem:[%s4656_s8 + $0x28] sm:$0xff]  }
 0x483   : > { %v1837_v46 = vmul.f32 %v4857_v26, %v1835_v42 }
 0x497   : > { %v1670_v25 = vpop.xlane.xlu0 %1669 }
 0x498   : > { %3860 = vrcp.f32 %v1670_v25 }
 0x49b   : > { %v1828_v31 = vpop.xlane.xlu0 %1827 }
 0x49c   : > { %3862 = vrcp.f32 %v1828_v31 }
 0x49d   : > { %3864 = vrcp.f32 %v1951_v4 }
 0x49f   : > { %v1954_v11 = vpop.xlane.xlu0 %1953 }
 0x4a0   : > { %3866 = vrcp.f32 %v1954_v11 }
 0x4a3   : > { %v2079_v39 = vpop.xlane.xlu0 %2078 }
 0x4a4   : > { %3868 = vrcp.f32 %v2079_v39 }
 0x4a5   : > { %v3861_v5 = vpop.eup %3860 }
 0x4a6   : > { %v1674_v58 = vmul.f32 %v3861_v5, %v1670_v25 }
 0x4a7   : > { %v2082_v61 = vpop.xlane.xlu0 %2081 }
 0x4a8   : > { %v1676_v3 = vsub.f32 2.0, %v1674_v58  ;;  %3870 = vrcp.f32 %v2082_v61 }
 0x4a9   : > { %v3863_v15 = vpop.eup %3862 }
 0x4aa   : > { %v1678_v18 = vmul.f32 %v3861_v5, %v1676_v3  ;;  %v1832_v10 = vmul.f32 %v3863_v15, %v1828_v31  ;;  %v3865_v23 = vpop.eup %3864 }
 0x4ab   : > { %v2209_v20 = vpop.xlane.xlu0 %2208  ;;  %v2206_v21 = vpop.xlane.xlu1 %2205  ;;  %v1957_v43 = vmul.f32 %v3865_v23, %v1951_v4 }
 0x4ac   : > { %v1680_v30 = vmul.f32 %v4882_v55, %v1678_v18  ;;  %v1834_v32 = vsub.f32 2.0, %v1832_v10  ;;  %3872 = vrcp.f32 %v2209_v20 }
 0x4ad   : > { %v3867_v22 = vpop.eup %3866  ;;  %3874 = vrcp.f32 %v2206_v21  ;;  %v1959_v50 = vsub.f32 2.0, %v1957_v43  ;;  %v3767_v43 = vld [vmem:[%s4656_s8 + $0x20] sm:$0xff]  }
 0x4ae   : > { %v1681_v37 = vpack.c.bf16 %v1680_v30, %v1679_v24  ;;  %v1836_v38 = vmul.f32 %v3863_v15, %v1834_v32  ;;  %v1958_v41 = vmul.f32 %v3867_v22, %v1954_v11  ;;  %v3765_v24 = vld [vmem:[%s4656_s8 + $0x30] sm:$0xff]  }
 0x4af   : > { %v1961_v56 = vmul.f32 %v3865_v23, %v1959_v50  ;;  %v1968_v59 = vpop.permute.xlu0 %1967  ;;  %v2095_v25 = vpop.permute.xlu1 %2094  ;;  %v3764_v23 = vld [vmem:[%s4656_s8 + $0x38] sm:$0xff]  }
 0x4b0   : > { %3527 = vmatmul.mubr.msk.bf16.vlgmr.msra.gmra.mxu0 %vm1271_vm2, %v1681_v37  ;;  %v1838_v19 = vmul.f32 %v4886_v0, %v1836_v38  ;;  %v1960_v45 = vsub.f32 2.0, %v1958_v41  ;;  %3578 = vmatprep.subr.bf16.mxu1 %v3764_v23 }
 0x4b1   : > { %3537 = vmatpush3.bf16.msra.mxu0 %v4731_v28  ;;  %3538 = vmatprep.mubr.msk.bf16.mxu0 %vm4210_vm0, %v4209_v35  ;;  %v3869_v55 = vpop.eup %3868  ;;  %v1963_v60 = vmul.f32 %v4861_v36, %v1961_v56 }
 0x4b2   : > { %3548 = vmatprep.subr.bf16.mxu0 %v4209_v35  ;;  %v1839_v52 = vpack.c.bf16 %v1838_v19, %v1837_v46  ;;  %v1962_v53 = vmul.f32 %v3867_v22, %v1960_v45  ;;  %v2085_v57 = vmul.f32 %v3869_v55, %v2079_v39  ;;  %3579 = vmatpush3.bf16.msra.mxu1 %v3764_v23  ;;  %v3768_v45 = vld [vmem:[%s4656_s8 + $0x18] sm:$0xff]  }
 0x4b3   : > { %v2222_v58 = vpop.permute.xlu1 %2221  ;;  %3580 = vmatprep.subr.bf16.mxu1 %v3765_v24 }
 0x4b4   : > { %v1964_v0 = vmul.f32 %v4890_v40, %v1962_v53  ;;  %v2087_v62 = vsub.f32 2.0, %v2085_v57  ;;  %v3770_v53 = vld [vmem:[%s4656_s8 + $0x8] sm:$0xff]  }
 0x4b5   : > { %v3871_v51 = vpop.eup %3870 }
 0x4b6   : > { %v2086_v54 = vmul.f32 %v3871_v51, %v2082_v61  ;;  %v1965_v4 = vpack.c.bf16 %v1964_v0, %v1963_v60  ;;  %v2089_v1 = vmul.f32 %v3869_v55, %v2087_v62  ;;  %3581 = vmatpush3.bf16.msra.mxu1 %v3765_v24 }
 0x4b7   : > { %3582 = vmatprep.subr.bf16.mxu1 %v3766_v27 }
 0x4b8   : > { %3539 = vmatmul.mubr.msk.bf16.vlgmr.msra.gmra.mxu0 %vm1271_vm2, %v1839_v52  ;;  %v2088_v7 = vsub.f32 2.0, %v2086_v54  ;;  %v2091_v11 = vmul.f32 %v4894_v9, %v2089_v1 }
 0x4b9   : > { %3549 = vmatpush3.bf16.msra.mxu0 %v1968_v59  ;;  %3550 = vmatprep.mubr.msk.bf16.mxu0 %vm4210_vm0, %v4209_v35  ;;  %v3873_v28 = vpop.eup %3872 }
 0x4ba   : > { %3560 = vmatprep.subr.bf16.mxu0 %v4209_v35  ;;  %v3875_v26 = vpop.eup %3874  ;;  %v2090_v8 = vmul.f32 %v3871_v51, %v2088_v7  ;;  %v2213_v16 = vmul.f32 %v3873_v28, %v2209_v20  ;;  %3583 = vmatpush3.bf16.msra.mxu1 %v3766_v27  ;;  %v3769_v51 = vld [vmem:[%s4656_s8 + $0x10] sm:$0xff]  }
 0x4bb   : > { %v2212_v63 = vmul.f32 %v3875_v26, %v2206_v21  ;;  %3584 = vmatprep.subr.bf16.mxu1 %v3767_v43 }
 0x4bc   : > { %v2092_v40 = vmul.f32 %v4898_v12, %v2090_v8  ;;  %v2215_v31 = vsub.f32 2.0, %v2213_v16 }
 0x4bd   : > { %v2214_v33 = vsub.f32 2.0, %v2212_v63 }
 0x4be   : > { %v2093_v39 = vpack.c.bf16 %v2092_v40, %v2091_v11  ;;  %v2217_v2 = vmul.f32 %v3873_v28, %v2215_v31  ;;  %3585 = vmatpush3.bf16.msra.mxu1 %v3767_v43  ;;  %v3771_v28 = vld [vmem:[%s4656_s8] sm:$0xff]   ;;  %v3892_v43 = vld [vmem:[#allocation2 + $0x10] sm:$0xff] }
 0x4bf   : > { %v2216_v29 = vmul.f32 %v3875_v26, %v2214_v33  ;;  %3586 = vmatprep.subr.bf16.mxu1 %v3768_v45 }
 0x4c0   : > { %3551 = vmatmul.mubr.msk.bf16.vlgmr.msra.gmra.mxu0 %vm1271_vm2, %v1965_v4  ;;  %v2219_v12 = vmul.f32 %v4904_v17, %v2217_v2 }
 0x4c1   : > { %3561 = vmatpush3.bf16.msra.mxu0 %v2095_v25  ;;  %3562 = vmatprep.mubr.msk.bf16.mxu0 %vm4210_vm0, %v4209_v35  ;;  %v2218_v34 = vmul.f32 %v4900_v14, %v2216_v29 }
 0x4c2   : > { %3572 = vmatprep.subr.bf16.mxu0 %v4209_v35  ;;  %v4948_v36 = vpop.f32.mrf.mxu0  ;;  %3587 = vmatpush3.bf16.msra.mxu1 %v3768_v45 }
 0x4c3   : > { %v2220_v9 = vpack.c.bf16 %v2219_v12, %v2218_v34  ;;  %3588 = vmatprep.subr.bf16.mxu1 %v3769_v51 }
 0x4c4   : > { %v3492_v13 = vpop.f32.mrf.mxu0 }
 0x4c6   : > { %v4951_v5 = vpop.f32.mrf.mxu0  ;;  %3589 = vmatpush3.bf16.msra.mxu1 %v3769_v51 }
 0x4c7   : > { %3590 = vmatprep.subr.bf16.mxu1 %v3770_v53 }
 0x4c8   : > { %3563 = vmatmul.mubr.msk.bf16.vlgmr.msra.gmra.mxu0 %vm1271_vm2, %v2093_v39  ;;  %v3493_v61 = vpop.f32.mrf.mxu0 }
 0x4c9   : > { %3573 = vmatpush3.bf16.msra.mxu0 %v2222_v58  ;;  %3574 = vmatprep.mubr.msk.bf16.mxu0 %vm4210_vm0, %v4209_v35 }
 0x4ca   : > { %3591 = vmatpush3.bf16.msra.mxu1 %v3770_v53 }
 0x4cb   : > { %3592 = vmatprep.subr.bf16.mxu1 %v3771_v28 }
 0x4ce   : > { %3593 = vmatpush3.bf16.msra.mxu1 %v3771_v28 }
 0x4d0   : > { %3575 = vmatmul.mubr.msk.bf16.vlgmr.msra.gmra.mxu0 %vm1271_vm2, %v2220_v9 }
 0x4d1   : > { %2633 = vmatprep.mubr.bf16.mxu0 %v4208_v6 }
 0x533   : > { %v1468_v44 = vpop.f32.mrf.mxu0 }
 0x535   : > { %v3504_v3 = vpop.f32.mrf.mxu0 }
 0x537   : > { %v1471_v15 = vpop.f32.mrf.mxu0 }
 0x538   : > { %v3702_v18 = vpack.i.bf16 %v1471_v15, %v1468_v44 }
 0x539   : > { %v3505_v10 = vpop.f32.mrf.mxu0 }
 0x53a   : > { %3703 = vrot.lane.b32.xlu1 %v3702_v18, %s4213_s22 }
 0x53b   : > { %v1595_v35 = vpop.f32.mrf.mxu0 }
 0x53d   : > { %v3516_v20 = vpop.f32.mrf.mxu0 }
 0x53f   : > { %v1598_v17 = vpop.f32.mrf.mxu0 }
 0x540   : > { %v3707_v21 = vpack.i.bf16 %v1598_v17, %v1595_v35 }
 0x541   : > { %v3517_v14 = vpop.f32.mrf.mxu0 }
 0x542   : > { %3708 = vrot.lane.b32.xlu1 %v3707_v21, %s4211_s6 }
 0x570   : > { %v1722_v30 = vpop.f32.mrf.mxu0 }
 0x572   : > { %v3528_v32 = vpop.f32.mrf.mxu0 }
 0x574   : > { %v1725_v22 = vpop.f32.mrf.mxu0 }
 0x575   : > { %v3712_v37 = vpack.i.bf16 %v1725_v22, %v1722_v30  ;;  %v3324_v22 = vld [vmem:[%s5224_s11] ss:$0 sm:$0xff] }
 0x576   : > { %v3529_v38 = vpop.f32.mrf.mxu0 }
 0x577   : > { %3713 = vrot.lane.b32.xlu1 %v3712_v37, %s4212_s23 }
 0x578   : > { %v4966_v41 = vpop.f32.mrf.mxu0 }
 0x57a   : > { %v3540_v42 = vpop.f32.mrf.mxu0 }
 0x57c   : > { %v1880_v19 = vpop.f32.mrf.mxu0 }
 0x57e   : > { %v3541_v55 = vpop.f32.mrf.mxu0 }
 0x580   : > { %v2007_v46 = vpop.f32.mrf.mxu0 }
 0x582   : > { %v3552_v50 = vpop.f32.mrf.mxu0 }
 0x583   : > { %v3893_v50 = vld [vmem:[#allocation2] sm:$0xff] }
 0x584   : > { %v2010_v52 = vpop.f32.mrf.mxu0 }
 0x585   : > { %v3717_v54 = vpack.i.bf16 %v2010_v52, %v2007_v46  ;;  %v3894_v52 = vld [vmem:[#allocation2 + $0x18] sm:$0xff] }
 0x586   : > { %v3553_v56 = vpop.f32.mrf.mxu0 }
 0x587   : > { %3718 = vrot.lane.b32.xlu0 %v3717_v54, %s4213_s22  ;;  %v3895_v54 = vld [vmem:[#allocation2 + $0x8] sm:$0xff] }
 0x588   : > { %v2134_v57 = vpop.f32.mrf.mxu0 }
 0x58a   : > { %v3564_v59 = vpop.f32.mrf.mxu0 }
 0x58b   : > { %v3774_v59 = vld [vmem:[%s4658_s3 + $0x74] ss:$8 sps:$4 sm:$0xff]  }
 0x58c   : > { %v2137_v0 = vpop.f32.mrf.mxu0  ;;  %2601 = vmatprep.subr.bf16.mxu0 %v3774_v59  ;;  %v3334_v59 = vld [vmem:[%s892_s4] ss:$0 sm:$0xff] }
 0x58d   : > { %v3722_v7 = vpack.i.bf16 %v2137_v0, %v2134_v57  ;;  %v3772_v57 = vld [vmem:[%s4658_s3 + $0x70] ss:$8 sps:$4 sm:$0xff]  }
 0x58e   : > { %v3565_v26 = vpop.f32.mrf.mxu0  ;;  %2602 = vmatpush1.bf16.msra.mxu0 %v3772_v57 }
 0x58f   : > { %3723 = vrot.lane.b32.xlu0 %v3722_v7, %s4211_s6  ;;  %s5232_s6 = sld [smem:[#allocation39_spill]] (!%p3370_p10) }
 0x590   : > { %v2261_v60 = vpop.f32.mrf.mxu0 }
 0x592   : > { %v3576_v62 = vpop.f32.mrf.mxu0 }
 0x594   : > { %v2264_v4 = vpop.f32.mrf.mxu0 }
 0x595   : > { %v3727_v8 = vpack.i.bf16 %v2264_v4, %v2261_v60 }
 0x596   : > { %v3577_v16 = vpop.f32.mrf.mxu0 }
 0x597   : > { %3728 = vrot.lane.b32.xlu1 %v3727_v8, %s4212_s23 }
 0x5ac   : > { %v3704_v63 = vpop.permute.xlu1 %3703 }
 0x5ad   : > { %v3706_v25 = vunpack.i.h.bf16 %v3704_v63  ;;  %v3705_v40 = vunpack.i.l.bf16 %v3704_v63 }
 0x5af   : > { %v1754_v13 = vsel %vm1223_vm1, %v4951_v5, %v3706_v25  ;;  %v1753_v39 = vsel %vm1223_vm1, %v4948_v36, %v3705_v40 }
 0x5b4   : > { %v3709_v1 = vpop.permute.xlu1 %3708 }
 0x5b5   : > { %v3711_v31 = vunpack.i.h.bf16 %v3709_v1  ;;  %v3710_v33 = vunpack.i.l.bf16 %v3709_v1 }
 0x5b7   : > { %v1757_v58 = vsel %vm1755_vm3, %v1754_v13, %v3711_v31  ;;  %v1756_v61 = vsel %vm1755_vm3, %v1753_v39, %v3710_v33  ;;  %v3777_v13 = vld [vmem:[%s4658_s3 + $0x64] ss:$8 sps:$4 sm:$0xff]   ;;  %v3775_v39 = vld [vmem:[%s4658_s3 + $0x60] ss:$8 sps:$4 sm:$0xff]  }
 0x5b8   : > { %2603 = vmatprep.subr.bf16.mxu0 %v3777_v13  ;;  %v3810_v13 = vld [vmem:[%s4660_s15 + $0x40] sm:$0xff]  }
 0x5b9   : > { %2604 = vmatpush1.bf16.msra.mxu0 %v3775_v39  ;;  %v3811_v39 = vld [vmem:[%s4660_s15] sm:$0xff]  }
 0x5e9   : > { %v3714_v11 = vpop.permute.xlu1 %3713 }
 0x5ea   : > { %v3716_v2 = vunpack.i.h.bf16 %v3714_v11  ;;  %v3715_v29 = vunpack.i.l.bf16 %v3714_v11 }
 0x5ec   : > { %v1759_v12 = vsel %vm1758_vm4, %v1756_v61, %v3715_v29  ;;  %v1760_v34 = vsel %vm1758_vm4, %v1757_v58, %v3716_v2  ;;  %v3780_v2 = vld [vmem:[%s4658_s3 + $0x54] ss:$8 sps:$4 sm:$0xff]   ;;  %v3778_v29 = vld [vmem:[%s4658_s3 + $0x50] ss:$8 sps:$4 sm:$0xff]   ;;  %v3783_v58 = vld [vmem:[%s4658_s3 + $0x44] ss:$8 sps:$4 sm:$0xff]  }
 0x5ed   : > { %v2298_v9 = vpack.c.bf16 %v1760_v34, %v1759_v12  ;;  %2605 = vmatprep.subr.bf16.mxu0 %v3780_v2  ;;  %v3781_v61 = vld [vmem:[%s4658_s3 + $0x40] ss:$8 sps:$4 sm:$0xff]   ;;  %v3786_v12 = vld [vmem:[%s4658_s3 + $0x34] ss:$8 sps:$4 sm:$0xff]   ;;  %v3784_v34 = vld [vmem:[%s4658_s3 + $0x30] ss:$8 sps:$4 sm:$0xff]  }
 0x5ee   : > { %2606 = vmatpush1.bf16.msra.mxu0 %v3778_v29 }
 0x5ef   : > { %3594 = vmatprep.mubr.bf16.mxu1 %v2298_v9  ;;  %2607 = vmatprep.subr.bf16.mxu0 %v3783_v58  ;;  %v3789_v9 = vld [vmem:[%s4658_s3 + $0x24] ss:$8 sps:$4 sm:$0xff]  }
 0x5f2   : > { %2608 = vmatpush1.bf16.msra.mxu0 %v3781_v61 }
 0x5f3   : > { %2609 = vmatprep.subr.bf16.mxu0 %v3786_v12 }
 0x5f6   : > { %2610 = vmatpush1.bf16.msra.mxu0 %v3784_v34 }
 0x5f7   : > { %2611 = vmatprep.subr.bf16.mxu0 %v3789_v9 }
 0x5f9   : > { %v3719_v44 = vpop.permute.xlu0 %3718 }
 0x5fa   : > { %v3721_v15 = vunpack.i.h.bf16 %v3719_v44  ;;  %v3720_v5 = vunpack.i.l.bf16 %v3719_v44  ;;  %v3787_v44 = vld [vmem:[%s4658_s3 + $0x20] ss:$8 sps:$4 sm:$0xff]  }
 0x5fb   : > { %2612 = vmatpush1.bf16.msra.mxu0 %v3787_v44 }
 0x5fc   : > { %v2293_v35 = vsel %vm1223_vm1, %v1880_v19, %v3721_v15  ;;  %v2292_v20 = vsel %vm1223_vm1, %v4966_v41, %v3720_v5  ;;  %v3790_v15 = vld [vmem:[%s4658_s3 + $0x10] ss:$8 sps:$4 sm:$0xff]   ;;  %v3795_v5 = vld [vmem:[%s4658_s3 + $0x4] ss:$8 sps:$4 sm:$0xff]  }
 0x601   : > { %v3724_v3 = vpop.permute.xlu0 %3723 }
 0x602   : > { %v3726_v18 = vunpack.i.h.bf16 %v3724_v3  ;;  %v3725_v10 = vunpack.i.l.bf16 %v3724_v3  ;;  %v3792_v3 = vld [vmem:[%s4658_s3 + $0x14] ss:$8 sps:$4 sm:$0xff]  }
 0x603   : > { %2613 = vmatprep.subr.bf16.mxu0 %v3792_v3 }
 0x604   : > { %v2295_v14 = vsel %vm1755_vm3, %v2293_v35, %v3726_v18  ;;  %v2294_v23 = vsel %vm1755_vm3, %v2292_v20, %v3725_v10  ;;  %2614 = vmatpush1.bf16.msra.mxu0 %v3790_v15  ;;  %v3793_v18 = vld [vmem:[%s4658_s3] ss:$8 sps:$4 sm:$0xff]   ;;  %v3796_v10 = vld [vmem:[%s4660_s15 + $0x78] sm:$0xff]   ;;  %v3798_v35 = vld [vmem:[%s4660_s15 + $0x70] sm:$0xff]  }
 0x605   : > { %2615 = vmatprep.subr.bf16.mxu0 %v3795_v5  ;;  %3434 = vmatprep.subr.bf16.mxu1 %v3796_v10  ;;  %v3799_v20 = vld [vmem:[%s4660_s15 + $0x30] sm:$0xff]  }
 0x608   : > { %2616 = vmatpush1.bf16.msra.mxu0 %v3793_v18 }
 0x609   : > { %v3729_v36 = vpop.permute.xlu1 %3728 }
 0x60a   : > { %v3731_v17 = vunpack.i.h.bf16 %v3729_v36  ;;  %v3730_v21 = vunpack.i.l.bf16 %v3729_v36  ;;  %v3797_v36 = vld [vmem:[%s4660_s15 + $0x38] sm:$0xff]  }
 0x60c   : > { %v2297_v24 = vsel %vm1758_vm4, %v2295_v14, %v3731_v17  ;;  %v2296_v27 = vsel %vm1758_vm4, %v2294_v23, %v3730_v21  ;;  %v3800_v17 = vld [vmem:[%s4660_s15 + $0x68] sm:$0xff]   ;;  %v3802_v14 = vld [vmem:[%s4660_s15 + $0x60] sm:$0xff]  }
 0x60d   : > { %v2299_v30 = vpack.c.bf16 %v2297_v24, %v2296_v27  ;;  %v3801_v21 = vld [vmem:[%s4660_s15 + $0x28] sm:$0xff]   ;;  %v3803_v23 = vld [vmem:[%s4660_s15 + $0x20] sm:$0xff]   ;;  %v3804_v24 = vld [vmem:[%s4660_s15 + $0x58] sm:$0xff]  }
 0x60e   : > { %v3805_v27 = vld [vmem:[%s4660_s15 + $0x18] sm:$0xff]  }
 0x60f   : > { %3595 = vmatmul.mubr.bf16.vlgmr.msra.gmra.mxu1 %v2299_v30 }
 0x610   : > { %3435 = vmatpush3.bf16.msra.mxu1 %v3797_v36 }
 0x611   : > { %3436 = vmatprep.subr.bf16.mxu1 %v3798_v35 }
 0x614   : > { %3437 = vmatpush3.bf16.msra.mxu1 %v3799_v20 }
 0x615   : > { %3438 = vmatprep.subr.bf16.mxu1 %v3800_v17 }
 0x618   : > { %3439 = vmatpush3.bf16.msra.mxu1 %v3801_v21 }
 0x619   : > { %3440 = vmatprep.subr.bf16.mxu1 %v3802_v14 }
 0x61c   : > { %3441 = vmatpush3.bf16.msra.mxu1 %v3803_v23 }
 0x61d   : > { %3442 = vmatprep.subr.bf16.mxu1 %v3804_v24 }
 0x620   : > { %3443 = vmatpush3.bf16.msra.mxu1 %v3805_v27 }
 0x6cf   : > { %v3596_v32 = vpop.f32.mrf.mxu1 }
 0x6d0   : > { %v2414_v42 = vadd.f32 %v3596_v32, %v3324_v22 }
 0x6d1   : > { %v2405_v37 = vpop.f32.mrf.mxu1 }
 0x6d2   : > { %v2406_v38 = vadd.f32 %v3324_v22, %v2405_v37  ;;  %v2422_v53 = vadd.f32 %v3894_v52, %v2414_v42  ;;  %v3333_v52 = vld [vmem:[%s5226_s30] ss:$0 sm:$0xff] }
 0x6d3   : > { %v3597_v41 = vpop.f32.mrf.mxu1 }
 0x6d4   : > { %v2420_v19 = vadd.f32 %v3892_v43, %v2406_v38  ;;  %v2417_v46 = vadd.f32 %v3597_v41, %v3324_v22 }
 0x6d5   : > { %v2408_v45 = vpop.f32.mrf.mxu1 }
 0x6d6   : > { %v2409_v55 = vadd.f32 %v3324_v22, %v2408_v45  ;;  %2426 = vadd.xlane.f32.xlu0 %v2420_v19  ;;  %v2423_v56 = vadd.f32 %v3895_v54, %v2417_v46 }
 0x6d8   : > { %v2421_v51 = vadd.f32 %v3893_v50, %v2409_v55 }
 0x6da   : > { %2428 = vadd.xlane.f32.xlu1 %v2421_v51  ;;  %2430 = vadd.xlane.f32.xlu0 %v2422_v53 }
 0x6de   : > { %2432 = vadd.xlane.f32.xlu0 %v2423_v56 }
 0x75f   : > { %v2427_v28 = vpop.xlane.xlu0 %2426 }
 0x760   : > { %v2435_v0 = vmul.f32 0.0078125, %v2427_v28 }
 0x762   : > { %v4998_v7 = vsub.f32 %v2420_v19, %v2435_v0 }
 0x763   : > { %v2429_v26 = vpop.xlane.xlu1 %2428  ;;  %v2431_v60 = vpop.xlane.xlu0 %2430 }
 0x764   : > { %v2436_v62 = vmul.f32 0.0078125, %v2429_v26  ;;  %v2437_v4 = vmul.f32 0.0078125, %v2431_v60  ;;  %v2443_v8 = vmul.f32 %v4998_v7, %v4998_v7 }
 0x766   : > { %v5002_v16 = vsub.f32 %v2421_v51, %v2436_v62  ;;  %v5004_v63 = vsub.f32 %v2422_v53, %v2437_v4  ;;  %2447 = vadd.xlane.f32.xlu1 %v2443_v8 }
 0x767   : > { %v2433_v1 = vpop.xlane.xlu0 %2432 }
 0x768   : > { %v2438_v25 = vmul.f32 0.0078125, %v2433_v1  ;;  %v2444_v40 = vmul.f32 %v5002_v16, %v5002_v16  ;;  %v2445_v31 = vmul.f32 %v5004_v63, %v5004_v63 }
 0x76a   : > { %v5010_v33 = vsub.f32 %v2423_v56, %v2438_v25  ;;  %2449 = vadd.xlane.f32.xlu0 %v2444_v40  ;;  %2451 = vadd.xlane.f32.xlu1 %v2445_v31  ;;  %v3807_v31 = vld [vmem:[%s4660_s15 + $0x10] sm:$0xff]  }
 0x76c   : > { %v2446_v11 = vmul.f32 %v5010_v33, %v5010_v33 }
 0x76e   : > { %2453 = vadd.xlane.f32.xlu0 %v2446_v11  ;;  %v3809_v11 = vld [vmem:[%s4660_s15 + $0x8] sm:$0xff]  }
 0x7ef   : > { %v2448_v30 = vpop.xlane.xlu1 %2447 }
 0x7f0   : > { %v2455_v32 = vmul.f32 0.0078125, %v2448_v30 }
 0x7f2   : > { %v2459_v22 = vadd.f32 1e-05, %v2455_v32 }
 0x7f3   : > { %v2452_v37 = vpop.xlane.xlu1 %2451  ;;  %v2450_v38 = vpop.xlane.xlu0 %2449 }
 0x7f4   : > { %3876 = vrsqrt.f32 %v2459_v22  ;;  %v2457_v41 = vmul.f32 0.0078125, %v2452_v37  ;;  %v2456_v42 = vmul.f32 0.0078125, %v2450_v38 }
 0x7f6   : > { %v2460_v43 = vadd.f32 1e-05, %v2456_v42  ;;  %v2461_v19 = vadd.f32 1e-05, %v2457_v41  ;;  %v3351_v42 = vld [vmem:[%s899_s24] ss:$0 sm:$0xff] }
 0x7f7   : > { %v2454_v45 = vpop.xlane.xlu0 %2453 }
 0x7f8   : > { %v2458_v55 = vmul.f32 0.0078125, %v2454_v45  ;;  %3878 = vrsqrt.f32 %v2460_v43 }
 0x7f9   : > { %3880 = vrsqrt.f32 %v2461_v19 }
 0x7fa   : > { %v2462_v46 = vadd.f32 1e-05, %v2458_v55 }
 0x7fc   : > { %3882 = vrsqrt.f32 %v2462_v46 }
 0x801   : > { %v3877_v50 = vpop.eup %3876 }
 0x802   : > { %v2467_v51 = vmul.f32 %v3877_v50, %v4998_v7 }
 0x804   : > { %v2477_v56 = vmul.f32 %v3333_v52, %v2467_v51 }
 0x805   : > { %v3879_v53 = vpop.eup %3878 }
 0x806   : > { %v2468_v54 = vmul.f32 %v3879_v53, %v5002_v16  ;;  %v3881_v57 = vpop.eup %3880  ;;  %v5051_v26 = vadd.f32 %v3334_v59, %v2477_v56 }
 0x807   : > { %v2469_v62 = vmul.f32 %v3881_v57, %v5004_v63  ;;  %v3806_v63 = vld [vmem:[%s4660_s15 + $0x50] sm:$0xff]  }
 0x808   : > { %v2478_v0 = vmul.f32 %v3333_v52, %v2468_v54  ;;  %3444 = vmatprep.subr.bf16.mxu1 %v3806_v63 }
 0x809   : > { %v3883_v28 = vpop.eup %3882  ;;  %v2479_v16 = vmul.f32 %v3333_v52, %v2469_v62  ;;  %3445 = vmatpush3.bf16.msra.mxu1 %v3807_v31 }
 0x80a   : > { %v2470_v7 = vmul.f32 %v3883_v28, %v5010_v33  ;;  %v5053_v60 = vadd.f32 %v3334_v59, %v2478_v0  ;;  %v3808_v33 = vld [vmem:[%s4660_s15 + $0x48] sm:$0xff]  }
 0x80b   : > { %v5061_v25 = vadd.f32 %v3334_v59, %v2479_v16  ;;  %3446 = vmatprep.subr.bf16.mxu1 %v3808_v33 }
 0x80c   : > { %v2491_v4 = vpack.c.bf16 %v5053_v60, %v5051_v26  ;;  %v2480_v8 = vmul.f32 %v3333_v52, %v2470_v7 }
 0x80d   : > { %3447 = vmatpush3.bf16.msra.mxu1 %v3809_v11 }
 0x80e   : > { %2634 = vmatmul.mubr.bf16.vlgmr.msra.gmra.mxu0 %v2491_v4  ;;  %v5059_v1 = vadd.f32 %v3334_v59, %v2480_v8  ;;  %3448 = vmatprep.subr.bf16.mxu1 %v3810_v13 }
 0x80f   : > { %2643 = vmatprep.mubr.bf16.mxu0 %v4208_v6  ;;  %v2509_v6 = vld [vmem:[%s4639_s14] sm:$0x3] }
 0x810   : > { %v2492_v40 = vpack.c.bf16 %v5059_v1, %v5061_v25  ;;  %v2518_v29 = vrot.slane %v2509_v6, %v957_v49  ;;  %v2514_v58 = vrot.slane %v2509_v6, %v953_v48 }
 0x811   : > { %3449 = vmatpush3.bf16.msra.mxu1 %v3811_v39 }
 0x816   : > { %2644 = vmatmul.mubr.bf16.gmra.mxu0 %v2492_v40 }
 0x8ce   : > { %v2635_v2 = vpop.f32.mrf.mxu0 }
 0x8cf   : > { %v2636_v44 = vadd.f32 %v2635_v2, %v2514_v58 }
 0x8d0   : > { %v2637_v61 = vpop.f32.mrf.mxu0 }
 0x8d1   : > { %v2638_v34 = vadd.f32 %v2637_v61, %v2518_v29  ;;  %v2654_v35 = vmax.f32 %v2636_v44, 0.0 }
 0x8d2   : > { %v2639_v12 = vpop.f32.mrf.mxu0 }
 0x8d3   : > { %v2640_v9 = vadd.f32 %v2639_v12, %v2514_v58  ;;  %v2655_v10 = vmax.f32 %v2638_v34, 0.0 }
 0x8d4   : > { %v2641_v3 = vpop.f32.mrf.mxu0 }
 0x8d5   : > { %v2642_v15 = vadd.f32 %v2641_v3, %v2518_v29  ;;  %v2656_v5 = vmax.f32 %v2640_v9, 0.0 }
 0x8d6   : > { %v2645_v18 = vpop.f32.mrf.mxu0 }
 0x8d7   : > { %v2657_v36 = vmax.f32 %v2642_v15, 0.0  ;;  %v2662_v21 = vpack.c.bf16 %v2656_v5, %v2654_v35  ;;  %v2646_v48 = vadd.f32 %v2645_v18, %v2514_v58 }
 0x8d8   : > { %v2647_v20 = vpop.f32.mrf.mxu0 }
 0x8d9   : > { %v2663_v17 = vpack.c.bf16 %v2657_v36, %v2655_v10  ;;  %v2648_v49 = vadd.f32 %v2647_v20, %v2518_v29  ;;  %v2658_v22 = vmax.f32 %v2646_v48, 0.0 }
 0x8da   : > { %v2649_v14 = vpop.f32.mrf.mxu0 }
 0x8db   : > { %v2650_v47 = vadd.f32 %v2649_v14, %v2514_v58  ;;  %2833 = vmatprep.mubr.bf16.mxu1 %v2663_v17  ;;  %v2659_v30 = vmax.f32 %v2648_v49, 0.0  ;;  %v3368_v17 = vld [vmem:[%s902_s5] ss:$0 sm:$0xff] }
 0x8dc   : > { %v2651_v23 = vpop.f32.mrf.mxu0  ;;  %2834 = vmatmul.mubr.bf16.vlgmr.msra.gmra.mxu1 %v2662_v21  ;;  %v3369_v14 = vld [vmem:[%s905_s29] ss:$0 sm:$0xff]  ;;  %s5231_s29 = sld [smem:[#allocation38_spill]] (!%p3370_p10) }
 0x8dd   : > { %v2652_v24 = vadd.f32 %v2651_v23, %v2518_v29  ;;  %v2660_v27 = vmax.f32 %v2650_v47, 0.0 }
 0x8df   : > { %v2661_v32 = vmax.f32 %v2652_v24, 0.0  ;;  %v2664_v38 = vpack.c.bf16 %v2660_v27, %v2658_v22 }
 0x8e1   : > { %v2665_v37 = vpack.c.bf16 %v2661_v32, %v2659_v30 }
 0x8e3   : > { %2841 = vmatprep.mubr.bf16.mxu1 %v2665_v37 }
 0x8e4   : > { %2842 = vmatmul.mubr.bf16.gmra.mxu1 %v2664_v38 }
 0x99c   : > { %v3450_v41 = vpop.f32.mrf.mxu1 }
 0x99e   : > { %v3451_v43 = vpop.f32.mrf.mxu1 }
 0x99f   : > { %v3452_v19 = vadd.f32 %v3451_v43, %v3450_v41 }
 0x9a0   : > { %v3453_v45 = vpop.f32.mrf.mxu1 }
 0x9a1   : > { %v2836_v55 = vadd.f32 %v3452_v19, %v3351_v42 }
 0x9a2   : > { %v3454_v46 = vpop.f32.mrf.mxu1 }
 0x9a3   : > { %v3455_v50 = vadd.f32 %v3454_v46, %v3453_v45  ;;  %v2850_v51 = vadd.f32 %v2836_v55, %v5051_v26 }
 0x9a4   : > { %v3456_v52 = vpop.f32.mrf.mxu1 }
 0x9a5   : > { %v2839_v53 = vadd.f32 %v3455_v50, %v3351_v42  ;;  %2856 = vadd.xlane.f32.xlu1 %v2850_v51 }
 0x9a6   : > { %v3457_v54 = vpop.f32.mrf.mxu1 }
 0x9a7   : > { %v3458_v56 = vadd.f32 %v3457_v54, %v3456_v52  ;;  %v2851_v57 = vadd.f32 %v2839_v53, %v5053_v60 }
 0x9a8   : > { %v3459_v59 = vpop.f32.mrf.mxu1 }
 0x9a9   : > { %v2844_v28 = vadd.f32 %v3458_v56, %v3351_v42  ;;  %2858 = vadd.xlane.f32.xlu0 %v2851_v57 }
 0x9aa   : > { %v3460_v0 = vpop.f32.mrf.mxu1 }
 0x9ab   : > { %v3461_v7 = vadd.f32 %v3460_v0, %v3459_v59  ;;  %v2852_v62 = vadd.f32 %v2844_v28, %v5061_v25 }
 0x9ad   : > { %v2847_v4 = vadd.f32 %v3461_v7, %v3351_v42  ;;  %2860 = vadd.xlane.f32.xlu1 %v2852_v62 }
 0x9af   : > { %v2853_v8 = vadd.f32 %v2847_v4, %v5059_v1 }
 0x9b1   : > { %2862 = vadd.xlane.f32.xlu0 %v2853_v8 }
 0xa2e   : > { %v2857_v26 = vpop.xlane.xlu1 %2856 }
 0xa2f   : > { %v2864_v16 = vmul.f32 0.0078125, %v2857_v26 }
 0xa31   : > { %v2868_v40 = vsub.f32 %v2850_v51, %v2864_v16 }
 0xa32   : > { %v2859_v63 = vpop.xlane.xlu0 %2858 }
 0xa33   : > { %v2865_v31 = vmul.f32 0.0078125, %v2859_v63  ;;  %v2872_v33 = vmul.f32 %v2868_v40, %v2868_v40 }
 0xa35   : > { %v2869_v11 = vsub.f32 %v2851_v57, %v2865_v31  ;;  %2876 = vadd.xlane.f32.xlu1 %v2872_v33 }
 0xa36   : > { %v2861_v60 = vpop.xlane.xlu1 %2860 }
 0xa37   : > { %v2866_v13 = vmul.f32 0.0078125, %v2861_v60  ;;  %v2873_v39 = vmul.f32 %v2869_v11, %v2869_v11 }
 0xa39   : > { %v2870_v6 = vsub.f32 %v2852_v62, %v2866_v13  ;;  %2878 = vadd.xlane.f32.xlu0 %v2873_v39 }
 0xa3a   : > { %v2863_v2 = vpop.xlane.xlu0 %2862 }
 0xa3b   : > { %v2867_v25 = vmul.f32 0.0078125, %v2863_v2  ;;  %v2874_v29 = vmul.f32 %v2870_v6, %v2870_v6 }
 0xa3d   : > { %v2871_v58 = vsub.f32 %v2853_v8, %v2867_v25  ;;  %2880 = vadd.xlane.f32.xlu1 %v2874_v29 }
 0xa3f   : > { %v2875_v1 = vmul.f32 %v2871_v58, %v2871_v58 }
 0xa41   : > { %2882 = vadd.xlane.f32.xlu0 %v2875_v1 }
 0xabe   : > { %v2877_v61 = vpop.xlane.xlu1 %2876 }
 0xabf   : > { %v2884_v12 = vmul.f32 0.0078125, %v2877_v61 }
 0xac1   : > { %v2888_v34 = vadd.f32 1e-05, %v2884_v12 }
 0xac2   : > { %v2879_v9 = vpop.xlane.xlu0 %2878 }
 0xac3   : > { %3884 = vrsqrt.f32 %v2888_v34  ;;  %v2885_v44 = vmul.f32 0.0078125, %v2879_v9 }
 0xac5   : > { %v2889_v3 = vadd.f32 1e-05, %v2885_v44 }
 0xac6   : > { %v2881_v15 = vpop.xlane.xlu1 %2880 }
 0xac7   : > { %3886 = vrsqrt.f32 %v2889_v3  ;;  %v2886_v5 = vmul.f32 0.0078125, %v2881_v15 }
 0xac9   : > { %v2890_v18 = vadd.f32 1e-05, %v2886_v5 }
 0xaca   : > { %v2883_v10 = vpop.xlane.xlu0 %2882 }
 0xacb   : > { %3888 = vrsqrt.f32 %v2890_v18  ;;  %v2887_v36 = vmul.f32 0.0078125, %v2883_v10 }
 0xacd   : > { %v2891_v35 = vadd.f32 1e-05, %v2887_v36 }
 0xacf   : > { %3890 = vrsqrt.f32 %v2891_v35 }
 0xad0   : > { %v3885_v20 = vpop.eup %3884 }
 0xad1   : > { %v2896_v21 = vmul.f32 %v3885_v20, %v2868_v40 }
 0xad3   : > { %v2906_v49 = vmul.f32 %v3368_v17, %v2896_v21 }
 0xad4   : > { %v3887_v47 = vpop.eup %3886 }
 0xad5   : > { %v2916_v48 = vadd.f32 %v3369_v14, %v2906_v49  ;;  %v2897_v23 = vmul.f32 %v3887_v47, %v2869_v11 }
 0xad7   : > { %2920 = vst [vmem:[#allocation2 + $0x10] sm:$0xff] %v2916_v48  ;;  %v2907_v24 = vmul.f32 %v3368_v17, %v2897_v23 }
 0xad8   : > { %v3889_v27 = vpop.eup %3888 }
 0xad9   : > { %v2917_v30 = vadd.f32 %v3369_v14, %v2907_v24  ;;  %v2898_v32 = vmul.f32 %v3889_v27, %v2870_v6 }
 0xadb   : > { %2921 = vst [vmem:[#allocation2] sm:$0xff] %v2917_v30  ;;  %v2908_v22 = vmul.f32 %v3368_v17, %v2898_v32 }
 0xadc   : > { %v3891_v37 = vpop.eup %3890 }
 0xadd   : > { %v2918_v38 = vadd.f32 %v3369_v14, %v2908_v22  ;;  %v2899_v41 = vmul.f32 %v3891_v37, %v2871_v58 }
 0xadf   : > { %2922 = vst [vmem:[#allocation2 + $0x18] sm:$0xff] %v2918_v38  ;;  %v2909_v42 = vmul.f32 %v3368_v17, %v2899_v41  ;;  %2927 = sbr.rel (%p3370_p10) target bundleno = 3103 (0xc1f), region = 132 }
 0xae1   : > { %v2919_v43 = vadd.f32 %v3369_v14, %v2909_v42 }
 0xae3   : > { %2923 = vst [vmem:[#allocation2 + $0x8] sm:$0xff] %v2919_v43 }
 0xae4   : > { %2930 = vadd.xlane.f32.xlu0 %v2916_v48  ;;  %2934 = vadd.xlane.f32.xlu1 %v2918_v38  ;;  %v3371_v2 = vld [vmem:[%s5231_s29] ss:$0 sm:$0xff] }
 0xae5   : > { %v3372_v29 = vld [vmem:[%s5232_s6] ss:$0 sm:$0xff] }
 0xae8   : > { %2932 = vadd.xlane.f32.xlu0 %v2917_v30  ;;  %2936 = vadd.xlane.f32.xlu1 %v2919_v43 }
 0xb6d   : > { %v2931_v19 = vpop.xlane.xlu0 %2930  ;;  %v2935_v45 = vpop.xlane.xlu1 %2934 }
 0xb6e   : > { %v2938_v55 = vmul.f32 0.0078125, %v2931_v19  ;;  %v2940_v46 = vmul.f32 0.0078125, %v2935_v45 }
 0xb70   : > { %v2942_v50 = vsub.f32 %v2916_v48, %v2938_v55  ;;  %v2944_v51 = vsub.f32 %v2918_v38, %v2940_v46 }
 0xb71   : > { %v2933_v52 = vpop.xlane.xlu0 %2932  ;;  %v2937_v53 = vpop.xlane.xlu1 %2936 }
 0xb72   : > { %v2939_v54 = vmul.f32 0.0078125, %v2933_v52  ;;  %v2946_v56 = vmul.f32 %v2942_v50, %v2942_v50  ;;  %v2941_v57 = vmul.f32 0.0078125, %v2937_v53  ;;  %v2948_v0 = vmul.f32 %v2944_v51, %v2944_v51 }
 0xb74   : > { %v2943_v59 = vsub.f32 %v2917_v30, %v2939_v54  ;;  %2950 = vadd.xlane.f32.xlu0 %v2946_v56  ;;  %v2945_v28 = vsub.f32 %v2919_v43, %v2941_v57 }
 0xb76   : > { %v2947_v7 = vmul.f32 %v2943_v59, %v2943_v59  ;;  %v2949_v62 = vmul.f32 %v2945_v28, %v2945_v28 }
 0xb78   : > { %2954 = vadd.xlane.f32.xlu0 %v2948_v0  ;;  %2952 = vadd.xlane.f32.xlu1 %v2947_v7 }
 0xb7c   : > { %2956 = vadd.xlane.f32.xlu1 %v2949_v62 }
 0xbfd   : > { %v2951_v4 = vpop.xlane.xlu0 %2950 }
 0xbfe   : > { %v2958_v8 = vmul.f32 0.0078125, %v2951_v4 }
 0xc00   : > { %v2962_v26 = vadd.f32 1e-05, %v2958_v8 }
 0xc01   : > { %v2953_v16 = vpop.xlane.xlu1 %2952  ;;  %v2955_v40 = vpop.xlane.xlu0 %2954 }
 0xc02   : > { %3896 = vrsqrt.f32 %v2962_v26  ;;  %v2959_v63 = vmul.f32 0.0078125, %v2953_v16  ;;  %v2960_v31 = vmul.f32 0.0078125, %v2955_v40 }
 0xc04   : > { %v2963_v33 = vadd.f32 1e-05, %v2959_v63  ;;  %v2964_v11 = vadd.f32 1e-05, %v2960_v31 }
 0xc05   : > { %v2957_v60 = vpop.xlane.xlu1 %2956 }
 0xc06   : > { %3898 = vrsqrt.f32 %v2963_v33  ;;  %v2961_v13 = vmul.f32 0.0078125, %v2957_v60 }
 0xc07   : > { %3900 = vrsqrt.f32 %v2964_v11 }
 0xc08   : > { %v2965_v39 = vadd.f32 1e-05, %v2961_v13 }
 0xc0a   : > { %3902 = vrsqrt.f32 %v2965_v39 }
 0xc0f   : > { %v3897_v6 = vpop.eup %3896 }
 0xc10   : > { %v2970_v25 = vmul.f32 %v3897_v6, %v2942_v50 }
 0xc12   : > { %v2980_v58 = vmul.f32 %v3371_v2, %v2970_v25 }
 0xc13   : > { %v3899_v1 = vpop.eup %3898 }
 0xc14   : > { %v3901_v61 = vpop.eup %3900  ;;  %v2990_v12 = vadd.f32 %v3372_v29, %v2980_v58  ;;  %v2971_v34 = vmul.f32 %v3899_v1, %v2943_v59 }
 0xc15   : > { %v2972_v9 = vmul.f32 %v3901_v61, %v2944_v51 }
 0xc16   : > { %2994 = vst [vmem:[#allocation14] sm:$0xff] %v2990_v12  ;;  %v2981_v44 = vmul.f32 %v3371_v2, %v2971_v34 }
 0xc17   : > { %v3903_v3 = vpop.eup %3902  ;;  %v2982_v15 = vmul.f32 %v3371_v2, %v2972_v9 }
 0xc18   : > { %v2991_v5 = vadd.f32 %v3372_v29, %v2981_v44  ;;  %v2973_v18 = vmul.f32 %v3903_v3, %v2945_v28 }
 0xc19   : > { %v2992_v10 = vadd.f32 %v3372_v29, %v2982_v15 }
 0xc1a   : > { %2995 = vst [vmem:[#allocation14 + $0x8] sm:$0xff] %v2991_v5  ;;  %v2983_v36 = vmul.f32 %v3371_v2, %v2973_v18 }
 0xc1b   : > { %2996 = vst [vmem:[#allocation14 + $0x10] sm:$0xff] %v2992_v10 }
 0xc1c   : > { %v2993_v35 = vadd.f32 %v3372_v29, %v2983_v36 }
 0xc1e   : > { %2997 = vst [vmem:[#allocation14 + $0x18] sm:$0xff] %v2993_v35 }
 0xc1f PF: > { %p3653_p12 = scmp.eq.s32.totalorder %s4331_s0, 1  ;;  %s4214_s23 = smov [#allocation14]  }
 0xc20   : > { %s3004_s22 = sshll.u32 %s4214_s23, 4  ;;  %s3005_s22 = int_to_ptr.vmem [resolvable:$true] %s3004_s22 }
 0xc21   : > { %s4124_s18 = scalar_lea.vmem %s3005_s22, 512  ;;  %p4131_p3 = scmp.lt.s32.totalorder %s3005_s22, %s3005_s22 }
 0xc22   : > { %p4125_p1 = scmp.ne.s32.totalorder %s3005_s22, %s4124_s18  ;;  %p4132_p5 = scmp.lt.s32.totalorder %s4124_s18, %s4124_s18 }
 0xc24   : > { %p4126_p13 = pnand %p4125_p1, %p3653_p12  ;;  %p4133_p6 = por %p4132_p5, %p4131_p3 }
 0xc26   : > { %p4127_p2 = pneg %p4126_p13 }
 0xc28   : > { %p4134_p7 = pnand %p4133_p6, %p4127_p2 }
 0xc2a   : > { %4137 = shalt.err (!%p4134_p7)
}
 0xc2b   : > { %s4215_s21 = smov 128   ;;  %s4216_s26 = smov 8  }
 0xc2c   : > { %s5233_s19 = sld [smem:[#allocation40_spill]] }
 0xc32   : > { %3619 = dma.vmem_to_hbm [thread:$0]  (%p3653_p12), %s3005_s22, 512, %s5233_s19, [#allocation5], %s4215_s21, %s4215_s21, %s4216_s26  }
 0xc33   : > { %4177 = dma.done.wait (%p3653_p12), [#allocation5], 512  }
 0xc34   : > { %4179 = vsyncadd (%p3653_p12), [#allocation5], 4294966784 }
 0xc35 PF: > { %s5234_s30 = sld [smem:[#allocation21_spill]] }
 0xc36   : > { %s5235_s27 = sld [smem:[#allocation19_spill]] }
 0xc37   : > { %s5236_s28 = sld [smem:[#allocation20_spill]] }
 0xc38   : > { %s5237_s29 = sld [smem:[#allocation22_spill]] }
 0xc3b   : > { %p28_p4 = scmp.ge.s32.totalorder %s5234_s30, 4  }
 0xc3d   :  { %30 = sbr.rel (!%p28_p4) target bundleno = 22 (0x16), region = 223 }
 0xc42   :  { %3020 = vsyncpa [#allocation4], 1 }
 0xc43   :  { %3022 = vsyncpa [#allocation4 + $0x1], 1 }
 0xc44   :  { %3023 = vsyncpa [#allocation7], 1 }
 0xc45   :  { %3024 = vsyncpa [#allocation5], 1 }
 0xc46   :  { %3026 = vsyncpa [#allocation5 + $0x1], 1 }

</bundles_post_ra>
